<compile_context>
chip_gen: v7x
topology: tpu7x:2x2x1
jax: 0.10.0
libtpu: 0.0.40
codegen_flags: <defaults>
</compile_context>

<pallas_src>
import jax
import jax.numpy as jnp
from jax.experimental import pallas as pl
from jax.experimental.pallas import tpu as pltpu


def _round_up(n, m):
    return ((n + m - 1) // m) * m


def _char_lstm_kernel(x_ref, h0_ref, c0_ref, wih_ref, whh_ref, b_ref,
                      wlin_ref, blin_ref,
                      y_ref, hN_ref, cN_ref,
                      h_scr, c_scr, hseq_scr):
    t_chunk_idx = pl.program_id(1)
    n_chunks = pl.num_programs(1)

    T_CHUNK, B_TILE, V_PAD = x_ref.shape
    H_PAD = h_scr.shape[-1]

    # Initialize the recurrent state from (h0, c0) on the first time chunk
    # of each batch tile (time axis is the innermost / fastest grid axis).
    @pl.when(t_chunk_idx == 0)
    def _():
        h_scr[...] = h0_ref[0]
        c_scr[...] = c0_ref[0]

    # ---- Chunk-batched input projection (bias folded in), one MXU matmul.
    # (T_CHUNK*B, V) @ (V, 4H) in bf16 with f32 accumulation.
    x2d = x_ref[...].reshape(T_CHUNK * B_TILE, V_PAD)          # bf16 input
    xw = (jnp.dot(x2d, wih_ref[...], preferred_element_type=jnp.float32)
          + b_ref[...])                                        # (T_CHUNK*B, 4H) f32
    xw = xw.reshape(T_CHUNK, B_TILE, 4 * H_PAD)

    whh = whh_ref[...]                                         # bf16, loaded once

    h_prev = h_scr[...]
    c_prev = c_scr[...]

    # ---- Serial recurrence over the chunk (fully unrolled, static indices).
    # Only the small (B, H) @ (H, 4H) matmul is on the critical path.
    for t in range(T_CHUNK):
        gates = xw[t] + jnp.dot(h_prev.astype(jnp.bfloat16), whh,
                                preferred_element_type=jnp.float32)  # (B, 4H)
        # PyTorch gate order [i, f, g, o]; H_PAD is a multiple of 128 so the
        # slices are lane-aligned (no cross-lane shuffles).
        i_g = jax.nn.sigmoid(gates[:, 0 * H_PAD:1 * H_PAD])
        f_g = jax.nn.sigmoid(gates[:, 1 * H_PAD:2 * H_PAD])
        g_g = jnp.tanh(gates[:, 2 * H_PAD:3 * H_PAD])
        o_g = jax.nn.sigmoid(gates[:, 3 * H_PAD:4 * H_PAD])

        c_new = f_g * c_prev + i_g * g_g
        h_new = o_g * jnp.tanh(c_new)

        hseq_scr[t] = h_new
        h_prev, c_prev = h_new, c_new

    h_scr[...] = h_prev
    c_scr[...] = c_prev

    # ---- Chunk-batched Linear head: one (T_CHUNK*B, H) @ (H, V) matmul,
    # lane-dense (V_PAD multiple of 128) output store.
    h2d = hseq_scr[...].reshape(T_CHUNK * B_TILE, H_PAD).astype(jnp.bfloat16)
    y2d = (jnp.dot(h2d, wlin_ref[...], preferred_element_type=jnp.float32)
           + blin_ref[...])
    y_ref[...] = y2d.reshape(T_CHUNK, B_TILE, V_PAD)

    # Final states written once, on the last time chunk.
    @pl.when(t_chunk_idx == n_chunks - 1)
    def _():
        hN_ref[0] = h_prev
        cN_ref[0] = c_prev


def char_lstm_forward(x, h0, c0, params, *, t_chunk=None):
    """Pallas forward pass. x: (T,B,V) f32; h0,c0: (1,B,H) f32."""
    T, B, V = x.shape
    H = h0.shape[-1]

    # vreg-friendly padded sizes.
    B_pad = _round_up(B, 8)
    V_pad = _round_up(V, 128)
    H_pad = _round_up(H, 128)

    # Largest divisor of T <= 64: amortizes per-grid-step overhead without
    # needing time padding (which would corrupt the h/c carry).
    if t_chunk is None:
        t_chunk = 1
        for d in range(1, T + 1):
            if T % d == 0 and d <= 64:
                t_chunk = d
    assert T % t_chunk == 0

    # Shard batch across TensorCores (v7x) when there is enough batch;
    # otherwise a single batch tile.
    if B_pad >= 16 and B_pad % 16 == 0:
        b_tile = B_pad // 2
    else:
        b_tile = B_pad

    f32 = jnp.float32
    bf16 = jnp.bfloat16

    # ---- Pad activations. x is cast to bf16 up front (halves DMA traffic).
    x_p = jnp.zeros((T, B_pad, V_pad), bf16).at[:, :B, :V].set(x.astype(bf16))
    h0_p = jnp.zeros((1, B_pad, H_pad), f32).at[:, :B, :H].set(h0)
    c0_p = jnp.zeros((1, B_pad, H_pad), f32).at[:, :B, :H].set(c0)

    # ---- Pad weights. The 4H axis must be padded *per gate* to keep the
    # PyTorch [i,f,g,o] layout aligned to H_pad blocks.
    w_ih = params["w_ih"].reshape(4, H, V)
    w_ih_p = jnp.zeros((4, H_pad, V_pad), f32).at[:, :H, :V].set(w_ih)
    wih_t = w_ih_p.reshape(4 * H_pad, V_pad).T.astype(bf16)        # (V_pad, 4H_pad)

    w_hh = params["w_hh"].reshape(4, H, H)
    w_hh_p = jnp.zeros((4, H_pad, H_pad), f32).at[:, :H, :H].set(w_hh)
    whh_t = w_hh_p.reshape(4 * H_pad, H_pad).T.astype(bf16)        # (H_pad, 4H_pad)

    b = (params["b_ih"] + params["b_hh"]).reshape(4, H)
    bias_p = jnp.zeros((4, H_pad), f32).at[:, :H].set(b).reshape(1, 4 * H_pad)

    wlin_t = jnp.zeros((H_pad, V_pad), f32).at[:H, :V].set(
        params["w_lin"].T).astype(bf16)                            # (H_pad, V_pad)
    blin_p = jnp.zeros((1, V_pad), f32).at[0, :V].set(params["b_lin"])

    out_shapes = (
        jax.ShapeDtypeStruct((T, B_pad, V_pad), f32),   # unsoftmax (padded)
        jax.ShapeDtypeStruct((1, B_pad, H_pad), f32),   # hN (padded)
        jax.ShapeDtypeStruct((1, B_pad, H_pad), f32),   # cN (padded)
    )

    grid = (B_pad // b_tile, T // t_chunk)

    grid_spec = pltpu.PrefetchScalarGridSpec(
        num_scalar_prefetch=0,
        grid=grid,
        in_specs=[
            pl.BlockSpec((t_chunk, b_tile, V_pad), lambda bi, ti: (ti, bi, 0)),  # x
            pl.BlockSpec((1, b_tile, H_pad), lambda bi, ti: (0, bi, 0)),         # h0
            pl.BlockSpec((1, b_tile, H_pad), lambda bi, ti: (0, bi, 0)),         # c0
            pl.BlockSpec((V_pad, 4 * H_pad), lambda bi, ti: (0, 0)),             # W_ih^T
            pl.BlockSpec((H_pad, 4 * H_pad), lambda bi, ti: (0, 0)),             # W_hh^T
            pl.BlockSpec((1, 4 * H_pad), lambda bi, ti: (0, 0)),                 # b_ih+b_hh
            pl.BlockSpec((H_pad, V_pad), lambda bi, ti: (0, 0)),                 # W_lin^T
            pl.BlockSpec((1, V_pad), lambda bi, ti: (0, 0)),                     # b_lin
        ],
        out_specs=[
            pl.BlockSpec((t_chunk, b_tile, V_pad), lambda bi, ti: (ti, bi, 0)),  # y
            pl.BlockSpec((1, b_tile, H_pad), lambda bi, ti: (0, bi, 0)),         # hN
            pl.BlockSpec((1, b_tile, H_pad), lambda bi, ti: (0, bi, 0)),         # cN
        ],
        scratch_shapes=[
            pltpu.VMEM((b_tile, H_pad), f32),                  # h carry
            pltpu.VMEM((b_tile, H_pad), f32),                  # c carry
            pltpu.VMEM((t_chunk, b_tile, H_pad), f32),         # per-chunk h sequence
        ],
    )

    # Explicit VMEM budget: resident weights + double-buffered chunk blocks
    # + scratch, with headroom; clamped to fit every TPU generation.
    block_bytes = (
        t_chunk * b_tile * V_pad * 2            # x chunk (bf16)
        + 2 * b_tile * H_pad * 4                # h0, c0 blocks
        + wih_t.nbytes + whh_t.nbytes + wlin_t.nbytes
        + bias_p.nbytes + blin_p.nbytes
        + t_chunk * b_tile * V_pad * 4          # y chunk
        + 2 * b_tile * H_pad * 4                # hN, cN blocks
    )
    scratch_bytes = (2 + t_chunk) * b_tile * H_pad * 4
    vmem_limit = 2 * block_bytes + scratch_bytes + (8 << 20)
    vmem_limit = int(min(max(vmem_limit, 32 << 20), 64 << 20))

    y_p, hN_p, cN_p = pl.pallas_call(
        _char_lstm_kernel,
        out_shape=out_shapes,
        grid_spec=grid_spec,
        compiler_params=pltpu.CompilerParams(
            dimension_semantics=("parallel", "arbitrary"),
            vmem_limit_bytes=vmem_limit),
    )(x_p, h0_p, c0_p, wih_t, whh_t, bias_p, wlin_t, blin_p)

    # Strip padding.
    y = y_p[:, :B, :V]
    hN = hN_p[:, :B, :H]
    cN = cN_p[:, :B, :H]
    return y, (hN, cN)


def _reference_forward(x, h0, c0, params):
    """Plain-JAX reference (seq_lens=None path), matching bf16 matmul numerics."""
    H = h0.shape[-1]
    bf16 = jnp.bfloat16
    wih_t = params["w_ih"].T.astype(bf16)     # (V, 4H)
    whh_t = params["w_hh"].T.astype(bf16)     # (H, 4H)
    wlin_t = params["w_lin"].T.astype(bf16)   # (H, V)
    b = (params["b_ih"] + params["b_hh"])[None, :]

    def step(carry, x_t):
        h, c = carry
        gates = (jnp.dot(x_t.astype(bf16), wih_t, preferred_element_type=jnp.float32)
                 + jnp.dot(h.astype(bf16), whh_t, preferred_element_type=jnp.float32)
                 + b)
        i_g = jax.nn.sigmoid(gates[:, 0 * H:1 * H])
        f_g = jax.nn.sigmoid(gates[:, 1 * H:2 * H])
        g_g = jnp.tanh(gates[:, 2 * H:3 * H])
        o_g = jax.nn.sigmoid(gates[:, 3 * H:4 * H])
        c_new = f_g * c + i_g * g_g
        h_new = o_g * jnp.tanh(c_new)
        return (h_new, c_new), h_new

    (hN, cN), outs = jax.lax.scan(step, (h0[0], c0[0]), x)
    T, B, _ = x.shape
    y = (jnp.dot(outs.reshape(T * B, H).astype(bf16), wlin_t,
                 preferred_element_type=jnp.float32)
         + params["b_lin"][None, :]).reshape(T, B, -1)
    return y, (hN[None], cN[None])


def init_params(key, vocab_size, hidden_size, init_range=0.1):
    """Deterministic param init mirroring CharLSTM.init_weights()."""
    k1, k2, k3 = jax.random.split(key, 3)
    H, V = hidden_size, vocab_size
    w_ih = jax.random.uniform(k1, (4 * H, V), jnp.float32, -init_range, init_range)
    w_hh = jax.random.uniform(k2, (4 * H, H), jnp.float32, -init_range, init_range)
    b_ih = jnp.zeros((4 * H,), jnp.float32)
    b_hh = jnp.zeros((4 * H,), jnp.float32)
    limit = (6.0 / (H + V)) ** 0.5          # xavier uniform (fan_in=H, fan_out=V)
    w_lin = jax.random.uniform(k3, (V, H), jnp.float32, -limit, limit)
    b_lin = jnp.zeros((V,), jnp.float32)
    return dict(w_ih=w_ih, w_hh=w_hh, b_ih=b_ih, b_hh=b_hh,
                w_lin=w_lin, b_lin=b_lin)


if __name__ == "__main__":
    T, B, V, H = 8, 2, 16, 32

    key = jax.random.PRNGKey(0)
    kx, kp = jax.random.split(key)
    x = jax.random.normal(kx, (T, B, V), jnp.float32)
    h0 = jnp.zeros((1, B, H), jnp.float32)
    c0 = jnp.zeros((1, B, H), jnp.float32)
    params = init_params(kp, V, H)

    y, (hN, cN) = char_lstm_forward(x, h0, c0, params)
    y = jax.block_until_ready(y)
    hN = jax.block_until_ready(hN)
    cN = jax.block_until_ready(cN)

    y_ref, (hN_ref, cN_ref) = _reference_forward(x, h0, c0, params)
    assert jnp.allclose(y, y_ref, atol=1e-3, rtol=1e-3), "output mismatch"
    assert jnp.allclose(hN, hN_ref, atol=1e-3, rtol=1e-3), "hN mismatch"
    assert jnp.allclose(cN, cN_ref, atol=1e-3, rtol=1e-3), "cN mismatch"

    print("KERNEL_OK")
</pallas_src>

<mosaic_0001>
module attributes {stable_mosaic.version = 11 : i64} {
  func.func @_char_lstm_kernel(%arg0: i32, %arg1: i32, %arg2: memref<8x8x128xbf16, #tpu.memory_space<vmem>>, %arg3: memref<1x8x128xf32, #tpu.memory_space<vmem>>, %arg4: memref<1x8x128xf32, #tpu.memory_space<vmem>>, %arg5: memref<128x512xbf16, #tpu.memory_space<vmem>>, %arg6: memref<128x512xbf16, #tpu.memory_space<vmem>>, %arg7: memref<1x512xf32, #tpu.memory_space<vmem>>, %arg8: memref<128x128xbf16, #tpu.memory_space<vmem>>, %arg9: memref<1x128xf32, #tpu.memory_space<vmem>>, %arg10: memref<8x8x128xf32, #tpu.memory_space<vmem>>, %arg11: memref<1x8x128xf32, #tpu.memory_space<vmem>>, %arg12: memref<1x8x128xf32, #tpu.memory_space<vmem>>, %arg13: memref<8x128xf32, #tpu.memory_space<vmem>>, %arg14: memref<8x128xf32, #tpu.memory_space<vmem>>, %arg15: memref<8x8x128xf32, #tpu.memory_space<vmem>>) attributes {dimension_semantics = [#tpu.dimension_semantics<parallel>, #tpu.dimension_semantics<arbitrary>], iteration_bounds = array<i64: 1, 1>, scalar_prefetch = 0 : i64, scratch_operands = 3 : i64, tpu.core_type = #tpu.core_type<tc>, window_params = [{transform_indices = @transform_0, window_bounds = array<i64: 8, 8, 128>}, {transform_indices = @transform_1, window_bounds = array<i64: 1, 8, 128>}, {transform_indices = @transform_2, window_bounds = array<i64: 1, 8, 128>}, {pipeline_mode = #tpu.pipeline_mode<synchronous>, transform_indices = @transform_3, window_bounds = array<i64: 128, 512>}, {pipeline_mode = #tpu.pipeline_mode<synchronous>, transform_indices = @transform_4, window_bounds = array<i64: 128, 512>}, {pipeline_mode = #tpu.pipeline_mode<synchronous>, transform_indices = @transform_5, window_bounds = array<i64: 1, 512>}, {pipeline_mode = #tpu.pipeline_mode<synchronous>, transform_indices = @transform_6, window_bounds = array<i64: 128, 128>}, {pipeline_mode = #tpu.pipeline_mode<synchronous>, transform_indices = @transform_7, window_bounds = array<i64: 1, 128>}, {transform_indices = @transform_8, window_bounds = array<i64: 8, 8, 128>}, {transform_indices = @transform_9, window_bounds = array<i64: 1, 8, 128>}, {transform_indices = @transform_10, window_bounds = array<i64: 1, 8, 128>}]} {
    %c0_i32 = arith.constant 0 : i32
    %0 = arith.cmpi eq, %arg1, %c0_i32 : i32
    %1 = arith.extui %0 : i1 to i32
    %c0_i32_0 = arith.constant 0 : i32
    %2 = arith.cmpi ne, %1, %c0_i32_0 : i32
    scf.if %2 {
      %c0_79 = arith.constant 0 : index
      %c0_80 = arith.constant 0 : index
      %c0_81 = arith.constant 0 : index
      %293 = vector.load %arg3[%c0_79, %c0_80, %c0_81] : memref<1x8x128xf32, #tpu.memory_space<vmem>>, vector<1x8x128xf32>
      %294 = vector.shape_cast %293 : vector<1x8x128xf32> to vector<8x128xf32>
      %c0_82 = arith.constant 0 : index
      %c0_83 = arith.constant 0 : index
      %295 = vector.load %arg13[%c0_82, %c0_83] : memref<8x128xf32, #tpu.memory_space<vmem>>, vector<8x128xf32>
      tpu.vector_store %arg13[%c0_82, %c0_83], %294 {strides = array<i32>} : memref<8x128xf32, #tpu.memory_space<vmem>>, vector<8x128xf32>,
      %c0_84 = arith.constant 0 : index
      %c0_85 = arith.constant 0 : index
      %c0_86 = arith.constant 0 : index
      %296 = vector.load %arg4[%c0_84, %c0_85, %c0_86] : memref<1x8x128xf32, #tpu.memory_space<vmem>>, vector<1x8x128xf32>
      %297 = vector.shape_cast %296 : vector<1x8x128xf32> to vector<8x128xf32>
      %c0_87 = arith.constant 0 : index
      %c0_88 = arith.constant 0 : index
      %298 = vector.load %arg14[%c0_87, %c0_88] : memref<8x128xf32, #tpu.memory_space<vmem>>, vector<8x128xf32>
      tpu.vector_store %arg14[%c0_87, %c0_88], %297 {strides = array<i32>} : memref<8x128xf32, #tpu.memory_space<vmem>>, vector<8x128xf32>,
    } else {
    }
    %c0 = arith.constant 0 : index
    %c0_1 = arith.constant 0 : index
    %c0_2 = arith.constant 0 : index
    %3 = vector.load %arg2[%c0, %c0_1, %c0_2] : memref<8x8x128xbf16, #tpu.memory_space<vmem>>, vector<8x8x128xbf16>
    %4 = vector.shape_cast %3 : vector<8x8x128xbf16> to vector<64x128xbf16>
    %c0_3 = arith.constant 0 : index
    %c0_4 = arith.constant 0 : index
    %5 = vector.load %arg5[%c0_3, %c0_4] : memref<128x512xbf16, #tpu.memory_space<vmem>>, vector<128x512xbf16>
    %cst = arith.constant dense<0.000000e+00> : vector<64x512xf32>
    %6 = tpu.matmul %4, %5, %cst {dimension_numbers = #tpu.dot_dimension_numbers<[1], [0], [0], [1], [0, 0, 1, 1], [], []>} : vector<64x128xbf16>, vector<128x512xbf16>, vector<64x512xf32> -> vector<64x512xf32>
    %c0_5 = arith.constant 0 : index
    %c0_6 = arith.constant 0 : index
    %7 = vector.load %arg7[%c0_5, %c0_6] : memref<1x512xf32, #tpu.memory_space<vmem>>, vector<1x512xf32>
    %8 = vector.broadcast %7 : vector<1x512xf32> to vector<64x512xf32>
    %9 = arith.addf %6, %8 : vector<64x512xf32>
    %10 = vector.shape_cast %9 : vector<64x512xf32> to vector<8x8x512xf32>
    %c0_7 = arith.constant 0 : index
    %c0_8 = arith.constant 0 : index
    %11 = vector.load %arg6[%c0_7, %c0_8] : memref<128x512xbf16, #tpu.memory_space<vmem>>, vector<128x512xbf16>
    %c0_9 = arith.constant 0 : index
    %c0_10 = arith.constant 0 : index
    %12 = vector.load %arg13[%c0_9, %c0_10] : memref<8x128xf32, #tpu.memory_space<vmem>>, vector<8x128xf32>
    %c0_11 = arith.constant 0 : index
    %c0_12 = arith.constant 0 : index
    %13 = vector.load %arg14[%c0_11, %c0_12] : memref<8x128xf32, #tpu.memory_space<vmem>>, vector<8x128xf32>
    %14 = vector.extract_strided_slice %10 {offsets = [0, 0, 0], sizes = [1, 8, 512], strides = [1, 1, 1]} : vector<8x8x512xf32> to vector<1x8x512xf32>
    %15 = vector.shape_cast %14 : vector<1x8x512xf32> to vector<8x512xf32>
    %16 = arith.truncf %12 : vector<8x128xf32> to vector<8x128xbf16>
    %cst_13 = arith.constant dense<0.000000e+00> : vector<8x512xf32>
    %17 = tpu.matmul %16, %11, %cst_13 {dimension_numbers = #tpu.dot_dimension_numbers<[1], [0], [0], [1], [0, 0, 1, 1], [], []>} : vector<8x128xbf16>, vector<128x512xbf16>, vector<8x512xf32> -> vector<8x512xf32>
    %18 = arith.addf %15, %17 : vector<8x512xf32>
    %19 = vector.extract_strided_slice %18 {offsets = [0, 0], sizes = [8, 128], strides = [1, 1]} : vector<8x512xf32> to vector<8x128xf32>
    %20 = arith.negf %19 : vector<8x128xf32>
    %21 = math.exp %20 : vector<8x128xf32>
    %cst_14 = arith.constant 1.000000e+00 : f32
    %22 = vector.broadcast %cst_14 : f32 to vector<8x128xf32>
    %23 = arith.addf %22, %21 : vector<8x128xf32>
    %24 = arith.divf %22, %23 : vector<8x128xf32>
    %25 = vector.extract_strided_slice %18 {offsets = [0, 128], sizes = [8, 128], strides = [1, 1]} : vector<8x512xf32> to vector<8x128xf32>
    %26 = arith.negf %25 : vector<8x128xf32>
    %27 = math.exp %26 : vector<8x128xf32>
    %cst_15 = arith.constant 1.000000e+00 : f32
    %28 = vector.broadcast %cst_15 : f32 to vector<8x128xf32>
    %29 = arith.addf %28, %27 : vector<8x128xf32>
    %30 = arith.divf %28, %29 : vector<8x128xf32>
    %31 = vector.extract_strided_slice %18 {offsets = [0, 256], sizes = [8, 128], strides = [1, 1]} : vector<8x512xf32> to vector<8x128xf32>
    %32 = math.tanh %31 : vector<8x128xf32>
    %33 = vector.extract_strided_slice %18 {offsets = [0, 384], sizes = [8, 128], strides = [1, 1]} : vector<8x512xf32> to vector<8x128xf32>
    %34 = arith.negf %33 : vector<8x128xf32>
    %35 = math.exp %34 : vector<8x128xf32>
    %cst_16 = arith.constant 1.000000e+00 : f32
    %36 = vector.broadcast %cst_16 : f32 to vector<8x128xf32>
    %37 = arith.addf %36, %35 : vector<8x128xf32>
    %38 = arith.divf %36, %37 : vector<8x128xf32>
    %39 = arith.mulf %30, %13 : vector<8x128xf32>
    %40 = arith.mulf %24, %32 : vector<8x128xf32>
    %41 = arith.addf %39, %40 : vector<8x128xf32>
    %42 = math.tanh %41 : vector<8x128xf32>
    %43 = arith.mulf %38, %42 : vector<8x128xf32>
    %c0_17 = arith.constant 0 : index
    %c0_18 = arith.constant 0 : index
    %c0_19 = arith.constant 0 : index
    %44 = vector.load %arg15[%c0_17, %c0_18, %c0_19] : memref<8x8x128xf32, #tpu.memory_space<vmem>>, vector<1x8x128xf32>
    %45 = vector.shape_cast %44 : vector<1x8x128xf32> to vector<8x128xf32>
    %46 = vector.shape_cast %43 : vector<8x128xf32> to vector<1x8x128xf32>
    tpu.vector_store %arg15[%c0_17, %c0_18, %c0_19], %46 {strides = array<i32>} : memref<8x8x128xf32, #tpu.memory_space<vmem>>, vector<1x8x128xf32>,
    %47 = vector.extract_strided_slice %10 {offsets = [1, 0, 0], sizes = [1, 8, 512], strides = [1, 1, 1]} : vector<8x8x512xf32> to vector<1x8x512xf32>
    %48 = vector.shape_cast %47 : vector<1x8x512xf32> to vector<8x512xf32>
    %49 = arith.truncf %43 : vector<8x128xf32> to vector<8x128xbf16>
    %cst_20 = arith.constant dense<0.000000e+00> : vector<8x512xf32>
    %50 = tpu.matmul %49, %11, %cst_20 {dimension_numbers = #tpu.dot_dimension_numbers<[1], [0], [0], [1], [0, 0, 1, 1], [], []>} : vector<8x128xbf16>, vector<128x512xbf16>, vector<8x512xf32> -> vector<8x512xf32>
    %51 = arith.addf %48, %50 : vector<8x512xf32>
    %52 = vector.extract_strided_slice %51 {offsets = [0, 0], sizes = [8, 128], strides = [1, 1]} : vector<8x512xf32> to vector<8x128xf32>
    %53 = arith.negf %52 : vector<8x128xf32>
    %54 = math.exp %53 : vector<8x128xf32>
    %cst_21 = arith.constant 1.000000e+00 : f32
    %55 = vector.broadcast %cst_21 : f32 to vector<8x128xf32>
    %56 = arith.addf %55, %54 : vector<8x128xf32>
    %57 = arith.divf %55, %56 : vector<8x128xf32>
    %58 = vector.extract_strided_slice %51 {offsets = [0, 128], sizes = [8, 128], strides = [1, 1]} : vector<8x512xf32> to vector<8x128xf32>
    %59 = arith.negf %58 : vector<8x128xf32>
    %60 = math.exp %59 : vector<8x128xf32>
    %cst_22 = arith.constant 1.000000e+00 : f32
    %61 = vector.broadcast %cst_22 : f32 to vector<8x128xf32>
    %62 = arith.addf %61, %60 : vector<8x128xf32>
    %63 = arith.divf %61, %62 : vector<8x128xf32>
    %64 = vector.extract_strided_slice %51 {offsets = [0, 256], sizes = [8, 128], strides = [1, 1]} : vector<8x512xf32> to vector<8x128xf32>
    %65 = math.tanh %64 : vector<8x128xf32>
    %66 = vector.extract_strided_slice %51 {offsets = [0, 384], sizes = [8, 128], strides = [1, 1]} : vector<8x512xf32> to vector<8x128xf32>
    %67 = arith.negf %66 : vector<8x128xf32>
    %68 = math.exp %67 : vector<8x128xf32>
    %cst_23 = arith.constant 1.000000e+00 : f32
    %69 = vector.broadcast %cst_23 : f32 to vector<8x128xf32>
    %70 = arith.addf %69, %68 : vector<8x128xf32>
    %71 = arith.divf %69, %70 : vector<8x128xf32>
    %72 = arith.mulf %63, %41 : vector<8x128xf32>
    %73 = arith.mulf %57, %65 : vector<8x128xf32>
    %74 = arith.addf %72, %73 : vector<8x128xf32>
    %75 = math.tanh %74 : vector<8x128xf32>
    %76 = arith.mulf %71, %75 : vector<8x128xf32>
    %c1 = arith.constant 1 : index
    %c0_24 = arith.constant 0 : index
    %c0_25 = arith.constant 0 : index
    %77 = vector.load %arg15[%c1, %c0_24, %c0_25] : memref<8x8x128xf32, #tpu.memory_space<vmem>>, vector<1x8x128xf32>
    %78 = vector.shape_cast %77 : vector<1x8x128xf32> to vector<8x128xf32>
    %79 = vector.shape_cast %76 : vector<8x128xf32> to vector<1x8x128xf32>
    tpu.vector_store %arg15[%c1, %c0_24, %c0_25], %79 {strides = array<i32>} : memref<8x8x128xf32, #tpu.memory_space<vmem>>, vector<1x8x128xf32>,
    %80 = vector.extract_strided_slice %10 {offsets = [2, 0, 0], sizes = [1, 8, 512], strides = [1, 1, 1]} : vector<8x8x512xf32> to vector<1x8x512xf32>
    %81 = vector.shape_cast %80 : vector<1x8x512xf32> to vector<8x512xf32>
    %82 = arith.truncf %76 : vector<8x128xf32> to vector<8x128xbf16>
    %cst_26 = arith.constant dense<0.000000e+00> : vector<8x512xf32>
    %83 = tpu.matmul %82, %11, %cst_26 {dimension_numbers = #tpu.dot_dimension_numbers<[1], [0], [0], [1], [0, 0, 1, 1], [], []>} : vector<8x128xbf16>, vector<128x512xbf16>, vector<8x512xf32> -> vector<8x512xf32>
    %84 = arith.addf %81, %83 : vector<8x512xf32>
    %85 = vector.extract_strided_slice %84 {offsets = [0, 0], sizes = [8, 128], strides = [1, 1]} : vector<8x512xf32> to vector<8x128xf32>
    %86 = arith.negf %85 : vector<8x128xf32>
    %87 = math.exp %86 : vector<8x128xf32>
    %cst_27 = arith.constant 1.000000e+00 : f32
    %88 = vector.broadcast %cst_27 : f32 to vector<8x128xf32>
    %89 = arith.addf %88, %87 : vector<8x128xf32>
    %90 = arith.divf %88, %89 : vector<8x128xf32>
    %91 = vector.extract_strided_slice %84 {offsets = [0, 128], sizes = [8, 128], strides = [1, 1]} : vector<8x512xf32> to vector<8x128xf32>
    %92 = arith.negf %91 : vector<8x128xf32>
    %93 = math.exp %92 : vector<8x128xf32>
    %cst_28 = arith.constant 1.000000e+00 : f32
    %94 = vector.broadcast %cst_28 : f32 to vector<8x128xf32>
    %95 = arith.addf %94, %93 : vector<8x128xf32>
    %96 = arith.divf %94, %95 : vector<8x128xf32>
    %97 = vector.extract_strided_slice %84 {offsets = [0, 256], sizes = [8, 128], strides = [1, 1]} : vector<8x512xf32> to vector<8x128xf32>
    %98 = math.tanh %97 : vector<8x128xf32>
    %99 = vector.extract_strided_slice %84 {offsets = [0, 384], sizes = [8, 128], strides = [1, 1]} : vector<8x512xf32> to vector<8x128xf32>
    %100 = arith.negf %99 : vector<8x128xf32>
    %101 = math.exp %100 : vector<8x128xf32>
    %cst_29 = arith.constant 1.000000e+00 : f32
    %102 = vector.broadcast %cst_29 : f32 to vector<8x128xf32>
    %103 = arith.addf %102, %101 : vector<8x128xf32>
    %104 = arith.divf %102, %103 : vector<8x128xf32>
    %105 = arith.mulf %96, %74 : vector<8x128xf32>
    %106 = arith.mulf %90, %98 : vector<8x128xf32>
    %107 = arith.addf %105, %106 : vector<8x128xf32>
    %108 = math.tanh %107 : vector<8x128xf32>
    %109 = arith.mulf %104, %108 : vector<8x128xf32>
    %c2 = arith.constant 2 : index
    %c0_30 = arith.constant 0 : index
    %c0_31 = arith.constant 0 : index
    %110 = vector.load %arg15[%c2, %c0_30, %c0_31] : memref<8x8x128xf32, #tpu.memory_space<vmem>>, vector<1x8x128xf32>
    %111 = vector.shape_cast %110 : vector<1x8x128xf32> to vector<8x128xf32>
    %112 = vector.shape_cast %109 : vector<8x128xf32> to vector<1x8x128xf32>
    tpu.vector_store %arg15[%c2, %c0_30, %c0_31], %112 {strides = array<i32>} : memref<8x8x128xf32, #tpu.memory_space<vmem>>, vector<1x8x128xf32>,
    %113 = vector.extract_strided_slice %10 {offsets = [3, 0, 0], sizes = [1, 8, 512], strides = [1, 1, 1]} : vector<8x8x512xf32> to vector<1x8x512xf32>
    %114 = vector.shape_cast %113 : vector<1x8x512xf32> to vector<8x512xf32>
    %115 = arith.truncf %109 : vector<8x128xf32> to vector<8x128xbf16>
    %cst_32 = arith.constant dense<0.000000e+00> : vector<8x512xf32>
    %116 = tpu.matmul %115, %11, %cst_32 {dimension_numbers = #tpu.dot_dimension_numbers<[1], [0], [0], [1], [0, 0, 1, 1], [], []>} : vector<8x128xbf16>, vector<128x512xbf16>, vector<8x512xf32> -> vector<8x512xf32>
    %117 = arith.addf %114, %116 : vector<8x512xf32>
    %118 = vector.extract_strided_slice %117 {offsets = [0, 0], sizes = [8, 128], strides = [1, 1]} : vector<8x512xf32> to vector<8x128xf32>
    %119 = arith.negf %118 : vector<8x128xf32>
    %120 = math.exp %119 : vector<8x128xf32>
    %cst_33 = arith.constant 1.000000e+00 : f32
    %121 = vector.broadcast %cst_33 : f32 to vector<8x128xf32>
    %122 = arith.addf %121, %120 : vector<8x128xf32>
    %123 = arith.divf %121, %122 : vector<8x128xf32>
    %124 = vector.extract_strided_slice %117 {offsets = [0, 128], sizes = [8, 128], strides = [1, 1]} : vector<8x512xf32> to vector<8x128xf32>
    %125 = arith.negf %124 : vector<8x128xf32>
    %126 = math.exp %125 : vector<8x128xf32>
    %cst_34 = arith.constant 1.000000e+00 : f32
    %127 = vector.broadcast %cst_34 : f32 to vector<8x128xf32>
    %128 = arith.addf %127, %126 : vector<8x128xf32>
    %129 = arith.divf %127, %128 : vector<8x128xf32>
    %130 = vector.extract_strided_slice %117 {offsets = [0, 256], sizes = [8, 128], strides = [1, 1]} : vector<8x512xf32> to vector<8x128xf32>
    %131 = math.tanh %130 : vector<8x128xf32>
    %132 = vector.extract_strided_slice %117 {offsets = [0, 384], sizes = [8, 128], strides = [1, 1]} : vector<8x512xf32> to vector<8x128xf32>
    %133 = arith.negf %132 : vector<8x128xf32>
    %134 = math.exp %133 : vector<8x128xf32>
    %cst_35 = arith.constant 1.000000e+00 : f32
    %135 = vector.broadcast %cst_35 : f32 to vector<8x128xf32>
    %136 = arith.addf %135, %134 : vector<8x128xf32>
    %137 = arith.divf %135, %136 : vector<8x128xf32>
    %138 = arith.mulf %129, %107 : vector<8x128xf32>
    %139 = arith.mulf %123, %131 : vector<8x128xf32>
    %140 = arith.addf %138, %139 : vector<8x128xf32>
    %141 = math.tanh %140 : vector<8x128xf32>
    %142 = arith.mulf %137, %141 : vector<8x128xf32>
    %c3 = arith.constant 3 : index
    %c0_36 = arith.constant 0 : index
    %c0_37 = arith.constant 0 : index
    %143 = vector.load %arg15[%c3, %c0_36, %c0_37] : memref<8x8x128xf32, #tpu.memory_space<vmem>>, vector<1x8x128xf32>
    %144 = vector.shape_cast %143 : vector<1x8x128xf32> to vector<8x128xf32>
    %145 = vector.shape_cast %142 : vector<8x128xf32> to vector<1x8x128xf32>
    tpu.vector_store %arg15[%c3, %c0_36, %c0_37], %145 {strides = array<i32>} : memref<8x8x128xf32, #tpu.memory_space<vmem>>, vector<1x8x128xf32>,
    %146 = vector.extract_strided_slice %10 {offsets = [4, 0, 0], sizes = [1, 8, 512], strides = [1, 1, 1]} : vector<8x8x512xf32> to vector<1x8x512xf32>
    %147 = vector.shape_cast %146 : vector<1x8x512xf32> to vector<8x512xf32>
    %148 = arith.truncf %142 : vector<8x128xf32> to vector<8x128xbf16>
    %cst_38 = arith.constant dense<0.000000e+00> : vector<8x512xf32>
    %149 = tpu.matmul %148, %11, %cst_38 {dimension_numbers = #tpu.dot_dimension_numbers<[1], [0], [0], [1], [0, 0, 1, 1], [], []>} : vector<8x128xbf16>, vector<128x512xbf16>, vector<8x512xf32> -> vector<8x512xf32>
    %150 = arith.addf %147, %149 : vector<8x512xf32>
    %151 = vector.extract_strided_slice %150 {offsets = [0, 0], sizes = [8, 128], strides = [1, 1]} : vector<8x512xf32> to vector<8x128xf32>
    %152 = arith.negf %151 : vector<8x128xf32>
    %153 = math.exp %152 : vector<8x128xf32>
    %cst_39 = arith.constant 1.000000e+00 : f32
    %154 = vector.broadcast %cst_39 : f32 to vector<8x128xf32>
    %155 = arith.addf %154, %153 : vector<8x128xf32>
    %156 = arith.divf %154, %155 : vector<8x128xf32>
    %157 = vector.extract_strided_slice %150 {offsets = [0, 128], sizes = [8, 128], strides = [1, 1]} : vector<8x512xf32> to vector<8x128xf32>
    %158 = arith.negf %157 : vector<8x128xf32>
    %159 = math.exp %158 : vector<8x128xf32>
    %cst_40 = arith.constant 1.000000e+00 : f32
    %160 = vector.broadcast %cst_40 : f32 to vector<8x128xf32>
    %161 = arith.addf %160, %159 : vector<8x128xf32>
    %162 = arith.divf %160, %161 : vector<8x128xf32>
    %163 = vector.extract_strided_slice %150 {offsets = [0, 256], sizes = [8, 128], strides = [1, 1]} : vector<8x512xf32> to vector<8x128xf32>
    %164 = math.tanh %163 : vector<8x128xf32>
    %165 = vector.extract_strided_slice %150 {offsets = [0, 384], sizes = [8, 128], strides = [1, 1]} : vector<8x512xf32> to vector<8x128xf32>
    %166 = arith.negf %165 : vector<8x128xf32>
    %167 = math.exp %166 : vector<8x128xf32>
    %cst_41 = arith.constant 1.000000e+00 : f32
    %168 = vector.broadcast %cst_41 : f32 to vector<8x128xf32>
    %169 = arith.addf %168, %167 : vector<8x128xf32>
    %170 = arith.divf %168, %169 : vector<8x128xf32>
    %171 = arith.mulf %162, %140 : vector<8x128xf32>
    %172 = arith.mulf %156, %164 : vector<8x128xf32>
    %173 = arith.addf %171, %172 : vector<8x128xf32>
    %174 = math.tanh %173 : vector<8x128xf32>
    %175 = arith.mulf %170, %174 : vector<8x128xf32>
    %c4 = arith.constant 4 : index
    %c0_42 = arith.constant 0 : index
    %c0_43 = arith.constant 0 : index
    %176 = vector.load %arg15[%c4, %c0_42, %c0_43] : memref<8x8x128xf32, #tpu.memory_space<vmem>>, vector<1x8x128xf32>
    %177 = vector.shape_cast %176 : vector<1x8x128xf32> to vector<8x128xf32>
    %178 = vector.shape_cast %175 : vector<8x128xf32> to vector<1x8x128xf32>
    tpu.vector_store %arg15[%c4, %c0_42, %c0_43], %178 {strides = array<i32>} : memref<8x8x128xf32, #tpu.memory_space<vmem>>, vector<1x8x128xf32>,
    %179 = vector.extract_strided_slice %10 {offsets = [5, 0, 0], sizes = [1, 8, 512], strides = [1, 1, 1]} : vector<8x8x512xf32> to vector<1x8x512xf32>
    %180 = vector.shape_cast %179 : vector<1x8x512xf32> to vector<8x512xf32>
    %181 = arith.truncf %175 : vector<8x128xf32> to vector<8x128xbf16>
    %cst_44 = arith.constant dense<0.000000e+00> : vector<8x512xf32>
    %182 = tpu.matmul %181, %11, %cst_44 {dimension_numbers = #tpu.dot_dimension_numbers<[1], [0], [0], [1], [0, 0, 1, 1], [], []>} : vector<8x128xbf16>, vector<128x512xbf16>, vector<8x512xf32> -> vector<8x512xf32>
    %183 = arith.addf %180, %182 : vector<8x512xf32>
    %184 = vector.extract_strided_slice %183 {offsets = [0, 0], sizes = [8, 128], strides = [1, 1]} : vector<8x512xf32> to vector<8x128xf32>
    %185 = arith.negf %184 : vector<8x128xf32>
    %186 = math.exp %185 : vector<8x128xf32>
    %cst_45 = arith.constant 1.000000e+00 : f32
    %187 = vector.broadcast %cst_45 : f32 to vector<8x128xf32>
    %188 = arith.addf %187, %186 : vector<8x128xf32>
    %189 = arith.divf %187, %188 : vector<8x128xf32>
    %190 = vector.extract_strided_slice %183 {offsets = [0, 128], sizes = [8, 128], strides = [1, 1]} : vector<8x512xf32> to vector<8x128xf32>
    %191 = arith.negf %190 : vector<8x128xf32>
    %192 = math.exp %191 : vector<8x128xf32>
    %cst_46 = arith.constant 1.000000e+00 : f32
    %193 = vector.broadcast %cst_46 : f32 to vector<8x128xf32>
    %194 = arith.addf %193, %192 : vector<8x128xf32>
    %195 = arith.divf %193, %194 : vector<8x128xf32>
    %196 = vector.extract_strided_slice %183 {offsets = [0, 256], sizes = [8, 128], strides = [1, 1]} : vector<8x512xf32> to vector<8x128xf32>
    %197 = math.tanh %196 : vector<8x128xf32>
    %198 = vector.extract_strided_slice %183 {offsets = [0, 384], sizes = [8, 128], strides = [1, 1]} : vector<8x512xf32> to vector<8x128xf32>
    %199 = arith.negf %198 : vector<8x128xf32>
    %200 = math.exp %199 : vector<8x128xf32>
    %cst_47 = arith.constant 1.000000e+00 : f32
    %201 = vector.broadcast %cst_47 : f32 to vector<8x128xf32>
    %202 = arith.addf %201, %200 : vector<8x128xf32>
    %203 = arith.divf %201, %202 : vector<8x128xf32>
    %204 = arith.mulf %195, %173 : vector<8x128xf32>
    %205 = arith.mulf %189, %197 : vector<8x128xf32>
    %206 = arith.addf %204, %205 : vector<8x128xf32>
    %207 = math.tanh %206 : vector<8x128xf32>
    %208 = arith.mulf %203, %207 : vector<8x128xf32>
    %c5 = arith.constant 5 : index
    %c0_48 = arith.constant 0 : index
    %c0_49 = arith.constant 0 : index
    %209 = vector.load %arg15[%c5, %c0_48, %c0_49] : memref<8x8x128xf32, #tpu.memory_space<vmem>>, vector<1x8x128xf32>
    %210 = vector.shape_cast %209 : vector<1x8x128xf32> to vector<8x128xf32>
    %211 = vector.shape_cast %208 : vector<8x128xf32> to vector<1x8x128xf32>
    tpu.vector_store %arg15[%c5, %c0_48, %c0_49], %211 {strides = array<i32>} : memref<8x8x128xf32, #tpu.memory_space<vmem>>, vector<1x8x128xf32>,
    %212 = vector.extract_strided_slice %10 {offsets = [6, 0, 0], sizes = [1, 8, 512], strides = [1, 1, 1]} : vector<8x8x512xf32> to vector<1x8x512xf32>
    %213 = vector.shape_cast %212 : vector<1x8x512xf32> to vector<8x512xf32>
    %214 = arith.truncf %208 : vector<8x128xf32> to vector<8x128xbf16>
    %cst_50 = arith.constant dense<0.000000e+00> : vector<8x512xf32>
    %215 = tpu.matmul %214, %11, %cst_50 {dimension_numbers = #tpu.dot_dimension_numbers<[1], [0], [0], [1], [0, 0, 1, 1], [], []>} : vector<8x128xbf16>, vector<128x512xbf16>, vector<8x512xf32> -> vector<8x512xf32>
    %216 = arith.addf %213, %215 : vector<8x512xf32>
    %217 = vector.extract_strided_slice %216 {offsets = [0, 0], sizes = [8, 128], strides = [1, 1]} : vector<8x512xf32> to vector<8x128xf32>
    %218 = arith.negf %217 : vector<8x128xf32>
    %219 = math.exp %218 : vector<8x128xf32>
    %cst_51 = arith.constant 1.000000e+00 : f32
    %220 = vector.broadcast %cst_51 : f32 to vector<8x128xf32>
    %221 = arith.addf %220, %219 : vector<8x128xf32>
    %222 = arith.divf %220, %221 : vector<8x128xf32>
    %223 = vector.extract_strided_slice %216 {offsets = [0, 128], sizes = [8, 128], strides = [1, 1]} : vector<8x512xf32> to vector<8x128xf32>
    %224 = arith.negf %223 : vector<8x128xf32>
    %225 = math.exp %224 : vector<8x128xf32>
    %cst_52 = arith.constant 1.000000e+00 : f32
    %226 = vector.broadcast %cst_52 : f32 to vector<8x128xf32>
    %227 = arith.addf %226, %225 : vector<8x128xf32>
    %228 = arith.divf %226, %227 : vector<8x128xf32>
    %229 = vector.extract_strided_slice %216 {offsets = [0, 256], sizes = [8, 128], strides = [1, 1]} : vector<8x512xf32> to vector<8x128xf32>
    %230 = math.tanh %229 : vector<8x128xf32>
    %231 = vector.extract_strided_slice %216 {offsets = [0, 384], sizes = [8, 128], strides = [1, 1]} : vector<8x512xf32> to vector<8x128xf32>
    %232 = arith.negf %231 : vector<8x128xf32>
    %233 = math.exp %232 : vector<8x128xf32>
    %cst_53 = arith.constant 1.000000e+00 : f32
    %234 = vector.broadcast %cst_53 : f32 to vector<8x128xf32>
    %235 = arith.addf %234, %233 : vector<8x128xf32>
    %236 = arith.divf %234, %235 : vector<8x128xf32>
    %237 = arith.mulf %228, %206 : vector<8x128xf32>
    %238 = arith.mulf %222, %230 : vector<8x128xf32>
    %239 = arith.addf %237, %238 : vector<8x128xf32>
    %240 = math.tanh %239 : vector<8x128xf32>
    %241 = arith.mulf %236, %240 : vector<8x128xf32>
    %c6 = arith.constant 6 : index
    %c0_54 = arith.constant 0 : index
    %c0_55 = arith.constant 0 : index
    %242 = vector.load %arg15[%c6, %c0_54, %c0_55] : memref<8x8x128xf32, #tpu.memory_space<vmem>>, vector<1x8x128xf32>
    %243 = vector.shape_cast %242 : vector<1x8x128xf32> to vector<8x128xf32>
    %244 = vector.shape_cast %241 : vector<8x128xf32> to vector<1x8x128xf32>
    tpu.vector_store %arg15[%c6, %c0_54, %c0_55], %244 {strides = array<i32>} : memref<8x8x128xf32, #tpu.memory_space<vmem>>, vector<1x8x128xf32>,
    %245 = vector.extract_strided_slice %10 {offsets = [7, 0, 0], sizes = [1, 8, 512], strides = [1, 1, 1]} : vector<8x8x512xf32> to vector<1x8x512xf32>
    %246 = vector.shape_cast %245 : vector<1x8x512xf32> to vector<8x512xf32>
    %247 = arith.truncf %241 : vector<8x128xf32> to vector<8x128xbf16>
    %cst_56 = arith.constant dense<0.000000e+00> : vector<8x512xf32>
    %248 = tpu.matmul %247, %11, %cst_56 {dimension_numbers = #tpu.dot_dimension_numbers<[1], [0], [0], [1], [0, 0, 1, 1], [], []>} : vector<8x128xbf16>, vector<128x512xbf16>, vector<8x512xf32> -> vector<8x512xf32>
    %249 = arith.addf %246, %248 : vector<8x512xf32>
    %250 = vector.extract_strided_slice %249 {offsets = [0, 0], sizes = [8, 128], strides = [1, 1]} : vector<8x512xf32> to vector<8x128xf32>
    %251 = arith.negf %250 : vector<8x128xf32>
    %252 = math.exp %251 : vector<8x128xf32>
    %cst_57 = arith.constant 1.000000e+00 : f32
    %253 = vector.broadcast %cst_57 : f32 to vector<8x128xf32>
    %254 = arith.addf %253, %252 : vector<8x128xf32>
    %255 = arith.divf %253, %254 : vector<8x128xf32>
    %256 = vector.extract_strided_slice %249 {offsets = [0, 128], sizes = [8, 128], strides = [1, 1]} : vector<8x512xf32> to vector<8x128xf32>
    %257 = arith.negf %256 : vector<8x128xf32>
    %258 = math.exp %257 : vector<8x128xf32>
    %cst_58 = arith.constant 1.000000e+00 : f32
    %259 = vector.broadcast %cst_58 : f32 to vector<8x128xf32>
    %260 = arith.addf %259, %258 : vector<8x128xf32>
    %261 = arith.divf %259, %260 : vector<8x128xf32>
    %262 = vector.extract_strided_slice %249 {offsets = [0, 256], sizes = [8, 128], strides = [1, 1]} : vector<8x512xf32> to vector<8x128xf32>
    %263 = math.tanh %262 : vector<8x128xf32>
    %264 = vector.extract_strided_slice %249 {offsets = [0, 384], sizes = [8, 128], strides = [1, 1]} : vector<8x512xf32> to vector<8x128xf32>
    %265 = arith.negf %264 : vector<8x128xf32>
    %266 = math.exp %265 : vector<8x128xf32>
    %cst_59 = arith.constant 1.000000e+00 : f32
    %267 = vector.broadcast %cst_59 : f32 to vector<8x128xf32>
    %268 = arith.addf %267, %266 : vector<8x128xf32>
    %269 = arith.divf %267, %268 : vector<8x128xf32>
    %270 = arith.mulf %261, %239 : vector<8x128xf32>
    %271 = arith.mulf %255, %263 : vector<8x128xf32>
    %272 = arith.addf %270, %271 : vector<8x128xf32>
    %273 = math.tanh %272 : vector<8x128xf32>
    %274 = arith.mulf %269, %273 : vector<8x128xf32>
    %c7 = arith.constant 7 : index
    %c0_60 = arith.constant 0 : index
    %c0_61 = arith.constant 0 : index
    %275 = vector.load %arg15[%c7, %c0_60, %c0_61] : memref<8x8x128xf32, #tpu.memory_space<vmem>>, vector<1x8x128xf32>
    %276 = vector.shape_cast %275 : vector<1x8x128xf32> to vector<8x128xf32>
    %277 = vector.shape_cast %274 : vector<8x128xf32> to vector<1x8x128xf32>
    tpu.vector_store %arg15[%c7, %c0_60, %c0_61], %277 {strides = array<i32>} : memref<8x8x128xf32, #tpu.memory_space<vmem>>, vector<1x8x128xf32>,
    %c0_62 = arith.constant 0 : index
    %c0_63 = arith.constant 0 : index
    %278 = vector.load %arg13[%c0_62, %c0_63] : memref<8x128xf32, #tpu.memory_space<vmem>>, vector<8x128xf32>
    tpu.vector_store %arg13[%c0_62, %c0_63], %274 {strides = array<i32>} : memref<8x128xf32, #tpu.memory_space<vmem>>, vector<8x128xf32>,
    %c0_64 = arith.constant 0 : index
    %c0_65 = arith.constant 0 : index
    %279 = vector.load %arg14[%c0_64, %c0_65] : memref<8x128xf32, #tpu.memory_space<vmem>>, vector<8x128xf32>
    tpu.vector_store %arg14[%c0_64, %c0_65], %272 {strides = array<i32>} : memref<8x128xf32, #tpu.memory_space<vmem>>, vector<8x128xf32>,
    %c0_66 = arith.constant 0 : index
    %c0_67 = arith.constant 0 : index
    %c0_68 = arith.constant 0 : index
    %280 = vector.load %arg15[%c0_66, %c0_67, %c0_68] : memref<8x8x128xf32, #tpu.memory_space<vmem>>, vector<8x8x128xf32>
    %281 = vector.shape_cast %280 : vector<8x8x128xf32> to vector<64x128xf32>
    %282 = arith.truncf %281 : vector<64x128xf32> to vector<64x128xbf16>
    %c0_69 = arith.constant 0 : index
    %c0_70 = arith.constant 0 : index
    %283 = vector.load %arg8[%c0_69, %c0_70] : memref<128x128xbf16, #tpu.memory_space<vmem>>, vector<128x128xbf16>
    %cst_71 = arith.constant dense<0.000000e+00> : vector<64x128xf32>
    %284 = tpu.matmul %282, %283, %cst_71 {dimension_numbers = #tpu.dot_dimension_numbers<[1], [0], [0], [1], [0, 0, 1, 1], [], []>} : vector<64x128xbf16>, vector<128x128xbf16>, vector<64x128xf32> -> vector<64x128xf32>
    %c0_72 = arith.constant 0 : index
    %c0_73 = arith.constant 0 : index
    %285 = vector.load %arg9[%c0_72, %c0_73] : memref<1x128xf32, #tpu.memory_space<vmem>>, vector<1x128xf32>
    %286 = vector.broadcast %285 : vector<1x128xf32> to vector<64x128xf32>
    %287 = arith.addf %284, %286 : vector<64x128xf32>
    %288 = vector.shape_cast %287 : vector<64x128xf32> to vector<8x8x128xf32>
    %c0_74 = arith.constant 0 : index
    %c0_75 = arith.constant 0 : index
    %c0_76 = arith.constant 0 : index
    %289 = vector.load %arg10[%c0_74, %c0_75, %c0_76] : memref<8x8x128xf32, #tpu.memory_space<vmem>>, vector<8x8x128xf32>
    tpu.vector_store %arg10[%c0_74, %c0_75, %c0_76], %288 {strides = array<i32>} : memref<8x8x128xf32, #tpu.memory_space<vmem>>, vector<8x8x128xf32>,
    %c0_i32_77 = arith.constant 0 : i32
    %290 = arith.cmpi eq, %arg1, %c0_i32_77 : i32
    %291 = arith.extui %290 : i1 to i32
    %c0_i32_78 = arith.constant 0 : i32
    %292 = arith.cmpi ne, %291, %c0_i32_78 : i32
    scf.if %292 {
      %c0_79 = arith.constant 0 : index
      %c0_80 = arith.constant 0 : index
      %c0_81 = arith.constant 0 : index
      %293 = vector.load %arg11[%c0_79, %c0_80, %c0_81] : memref<1x8x128xf32, #tpu.memory_space<vmem>>, vector<1x8x128xf32>
      %294 = vector.shape_cast %293 : vector<1x8x128xf32> to vector<8x128xf32>
      %295 = vector.shape_cast %274 : vector<8x128xf32> to vector<1x8x128xf32>
      tpu.vector_store %arg11[%c0_79, %c0_80, %c0_81], %295 {strides = array<i32>} : memref<1x8x128xf32, #tpu.memory_space<vmem>>, vector<1x8x128xf32>,
      %c0_82 = arith.constant 0 : index
      %c0_83 = arith.constant 0 : index
      %c0_84 = arith.constant 0 : index
      %296 = vector.load %arg12[%c0_82, %c0_83, %c0_84] : memref<1x8x128xf32, #tpu.memory_space<vmem>>, vector<1x8x128xf32>
      %297 = vector.shape_cast %296 : vector<1x8x128xf32> to vector<8x128xf32>
      %298 = vector.shape_cast %272 : vector<8x128xf32> to vector<1x8x128xf32>
      tpu.vector_store %arg12[%c0_82, %c0_83, %c0_84], %298 {strides = array<i32>} : memref<1x8x128xf32, #tpu.memory_space<vmem>>, vector<1x8x128xf32>,
    } else {
    }
    return
  }
  func.func @transform_0(%arg0: i32, %arg1: i32) -> (i32, i32, i32) {
    %c0_i32 = arith.constant 0 : i32
    %c0_i32_0 = arith.constant 0 : i32
    return %arg1, %arg0, %c0_i32 : i32, i32, i32
  }
  func.func @transform_1(%arg0: i32, %arg1: i32) -> (i32, i32, i32) {
    %c0_i32 = arith.constant 0 : i32
    %c0_i32_0 = arith.constant 0 : i32
    %c0_i32_1 = arith.constant 0 : i32
    return %c0_i32, %arg0, %c0_i32_0 : i32, i32, i32
  }
  func.func @transform_2(%arg0: i32, %arg1: i32) -> (i32, i32, i32) {
    %c0_i32 = arith.constant 0 : i32
    %c0_i32_0 = arith.constant 0 : i32
    %c0_i32_1 = arith.constant 0 : i32
    return %c0_i32, %arg0, %c0_i32_0 : i32, i32, i32
  }
  func.func @transform_3(%arg0: i32, %arg1: i32) -> (i32, i32) {
    %c0_i32 = arith.constant 0 : i32
    %c0_i32_0 = arith.constant 0 : i32
    %c0_i32_1 = arith.constant 0 : i32
    return %c0_i32, %c0_i32_0 : i32, i32
  }
  func.func @transform_4(%arg0: i32, %arg1: i32) -> (i32, i32) {
    %c0_i32 = arith.constant 0 : i32
    %c0_i32_0 = arith.constant 0 : i32
    %c0_i32_1 = arith.constant 0 : i32
    return %c0_i32, %c0_i32_0 : i32, i32
  }
  func.func @transform_5(%arg0: i32, %arg1: i32) -> (i32, i32) {
    %c0_i32 = arith.constant 0 : i32
    %c0_i32_0 = arith.constant 0 : i32
    %c0_i32_1 = arith.constant 0 : i32
    return %c0_i32, %c0_i32_0 : i32, i32
  }
  func.func @transform_6(%arg0: i32, %arg1: i32) -> (i32, i32) {
    %c0_i32 = arith.constant 0 : i32
    %c0_i32_0 = arith.constant 0 : i32
    %c0_i32_1 = arith.constant 0 : i32
    return %c0_i32, %c0_i32_0 : i32, i32
  }
  func.func @transform_7(%arg0: i32, %arg1: i32) -> (i32, i32) {
    %c0_i32 = arith.constant 0 : i32
    %c0_i32_0 = arith.constant 0 : i32
    %c0_i32_1 = arith.constant 0 : i32
    return %c0_i32, %c0_i32_0 : i32, i32
  }
  func.func @transform_8(%arg0: i32, %arg1: i32) -> (i32, i32, i32) {
    %c0_i32 = arith.constant 0 : i32
    %c0_i32_0 = arith.constant 0 : i32
    return %arg1, %arg0, %c0_i32 : i32, i32, i32
  }
  func.func @transform_9(%arg0: i32, %arg1: i32) -> (i32, i32, i32) {
    %c0_i32 = arith.constant 0 : i32
    %c0_i32_0 = arith.constant 0 : i32
    %c0_i32_1 = arith.constant 0 : i32
    return %c0_i32, %arg0, %c0_i32_0 : i32, i32, i32
  }
  func.func @transform_10(%arg0: i32, %arg1: i32) -> (i32, i32, i32) {
    %c0_i32 = arith.constant 0 : i32
    %c0_i32_0 = arith.constant 0 : i32
    %c0_i32_1 = arith.constant 0 : i32
    return %c0_i32, %arg0, %c0_i32_0 : i32, i32, i32
  }
}

</mosaic_0001>

<bundles_post_ra>
// kernel: tpu_custom_call.1
= control target key start
LH: loop header
LB: loop body
LE: loop exit
PB: predicated region body
PF: predicated region fallthrough
CT: control target
= control target key end

     0   :  { %16 = vsyncpa [#allocation6], 0  ;;  %s3180_s0 = inlined_call_operand.hbm [shape: bf16[8,8,128], index: 0, kind: input, shape index: {}]   ;;  %s3181_s1 = inlined_call_operand.hbm [shape: f32[1,8,128], index: 1, kind: input, shape index: {}]   ;;  %s3182_s2 = inlined_call_operand.hbm [shape: f32[1,8,128], index: 2, kind: input, shape index: {}]   ;;  %s3183_s3 = inlined_call_operand.hbm [shape: bf16[128,512], index: 3, kind: input, shape index: {}]   ;;  %s3184_s4 = inlined_call_operand.hbm [shape: bf16[128,512], index: 4, kind: input, shape index: {}]   ;;  %s3185_s5 = inlined_call_operand.vmem [shape: f32[1,512], index: 5, kind: input, shape index: {}]   ;;  %s3186_s6 = inlined_call_operand.hbm [shape: bf16[128,128], index: 6, kind: input, shape index: {}]   ;;  %s3187_s7 = inlined_call_operand.vmem [shape: f32[1,128], index: 7, kind: input, shape index: {}]   ;;  %s3188_s8 = inlined_call_operand.hbm [shape: f32[8,8,128], index: 8, kind: output, shape index: {0}]   ;;  %s3189_s9 = inlined_call_operand.hbm [shape: f32[1,8,128], index: 9, kind: output, shape index: {1}]   ;;  %s3190_s10 = inlined_call_operand.hbm [shape: f32[1,8,128], index: 10, kind: output, shape index: {2}]  }
   0x1   :  { %17 = vsyncpa [#allocation9], 0 }
   0x2   :  { %18 = vsyncpa [#allocation12], 0 }
   0x3   :  { %19 = vsyncpa [#allocation15], 0 }
   0x4   :  { %20 = vsyncpa [#allocation7], 0 }
   0x5   :  { %21 = vsyncpa [#allocation18], 0  ;;  %s2451_s13 = smov [#allocation8]   ;;  %s2452_s15 = smov [#allocation11]  }
   0x6   :  { %s40_s14 = sshll.u32 %s2451_s13, 4  ;;  %s59_s16 = sshll.u32 %s2452_s15, 4  ;;  %s41_s14 = int_to_ptr.vmem [resolvable:$true] %s40_s14  ;;  %s2522_s16 = int_to_ptr.vmem [resolvable:$true] %s59_s16 }
   0x7   :  { %s2241_s19 = scalar_lea.hbm %s3181_s1, 128 }
   0x8   :  { %p2242_p0 = scmp.ne.s32.totalorder %s3181_s1, %s2241_s19  ;;  %p2245_p1 = scmp.lt.u32.totalorder %s2241_s19, %s3181_s1 }
   0xa   :  { %p2247_p2 = pnand %p2245_p1, %p2242_p0 }
   0xc   :  { %2250 = shalt.err (!%p2247_p2)
}
   0xd   :  { %s2251_s24 = scalar_lea.vmem %s41_s14, 128  ;;  %p2256_p4 = scmp.lt.s32.totalorder %s41_s14, %s41_s14 }
   0xe   :  { %p2252_p3 = scmp.ne.s32.totalorder %s41_s14, %s2251_s24  ;;  %p2257_p5 = scmp.lt.s32.totalorder %s2251_s24, %s2251_s24 }
  0x10   :  { %p2258_p6 = por %p2257_p5, %p2256_p4 }
  0x12   :  { %p2259_p7 = pnand %p2258_p6, %p2252_p3 }
  0x14   :  { %2262 = shalt.err (!%p2259_p7)
}
  0x15   :  { %43 = dma.hbm_to_vmem [thread:$0]  %s3181_s1, 128, %s41_s14, [#allocation9]  }
  0x16   :  { %s2263_s29 = scalar_lea.hbm %s3183_s3, 4096 }
  0x17   :  { %p2264_p8 = scmp.ne.s32.totalorder %s3183_s3, %s2263_s29  ;;  %p2267_p9 = scmp.lt.u32.totalorder %s2263_s29, %s3183_s3 }
  0x19   :  { %p2269_p10 = pnand %p2267_p9, %p2264_p8 }
  0x1b   :  { %2272 = shalt.err (!%p2269_p10)
}
  0x1c   :  { %s2273_s15 = scalar_lea.vmem %s2522_s16, 4096  ;;  %p2278_p12 = scmp.lt.s32.totalorder %s2522_s16, %s2522_s16 }
  0x1d   :  { %p2274_p11 = scmp.ne.s32.totalorder %s2522_s16, %s2273_s15  ;;  %p2279_p13 = scmp.lt.s32.totalorder %s2273_s15, %s2273_s15 }
  0x1f   :  { %p2280_p0 = por %p2279_p13, %p2278_p12 }
  0x21   :  { %p2281_p1 = pnand %p2280_p0, %p2274_p11 }
  0x23   :  { %2284 = shalt.err (!%p2281_p1)
}
  0x24   :  { %s2453_s1 = smov 256   ;;  %s2454_s14 = smov 16  }
  0x25   :  { %65 = dma.hbm_to_vmem [thread:$0]  %s3183_s3, 4096, %s2522_s16, [#allocation12], %s2453_s1, %s2453_s1, %s2454_s14  }
  0x26   :  { %s2455_s19 = smov [#allocation5]   ;;  %s2285_s23 = scalar_lea.hbm %s3180_s0, 512 }
  0x27   :  { %s27_s20 = sshll.u32 %s2455_s19, 4  ;;  %p2286_p2 = scmp.ne.s32.totalorder %s3180_s0, %s2285_s23  ;;  %s28_s20 = int_to_ptr.vmem [resolvable:$true] %s27_s20 }
  0x28   :  { %p2289_p3 = scmp.lt.u32.totalorder %s2285_s23, %s3180_s0 }
  0x2a   :  { %p2291_p4 = pnand %p2289_p3, %p2286_p2 }
  0x2c   :  { %2294 = shalt.err (!%p2291_p4)
}
  0x2d   :  { %s2295_s28 = scalar_lea.vmem %s28_s20, 512  ;;  %p2300_p6 = scmp.lt.s32.totalorder %s28_s20, %s28_s20 }
  0x2e   :  { %p2296_p5 = scmp.ne.s32.totalorder %s28_s20, %s2295_s28  ;;  %p2301_p7 = scmp.lt.s32.totalorder %s2295_s28, %s2295_s28 }
  0x30   :  { %p2302_p8 = por %p2301_p7, %p2300_p6 }
  0x32   :  { %p2303_p9 = pnand %p2302_p8, %p2296_p5 }
  0x34   :  { %2306 = shalt.err (!%p2303_p9)
}
  0x35   :  { %s2456_s3 = smov 64   ;;  %s2457_s16 = smov 4  }
  0x36   :  { %33 = dma.hbm_to_vmem [thread:$0]  %s3180_s0, 512, %s28_s20, [#allocation6], %s2456_s3, %s2456_s3, %s2457_s16  }
  0x37   :  { %s2458_s11 = smov [#allocation10]   ;;  %s2459_s13 = smov [#allocation13]  }
  0x38   :  { %s50_s12 = sshll.u32 %s2458_s11, 4  ;;  %s71_s15 = sshll.u32 %s2459_s13, 4  ;;  %s51_s12 = int_to_ptr.vmem [resolvable:$true] %s50_s12  ;;  %s72_s15 = int_to_ptr.vmem [resolvable:$true] %s71_s15 }
  0x39   :  { %s2307_s19 = scalar_lea.hbm %s3182_s2, 128 }
  0x3a   :  { %p2308_p10 = scmp.ne.s32.totalorder %s3182_s2, %s2307_s19  ;;  %p2311_p11 = scmp.lt.u32.totalorder %s2307_s19, %s3182_s2 }
  0x3c   :  { %p2313_p12 = pnand %p2311_p11, %p2308_p10 }
  0x3e   :  { %2316 = shalt.err (!%p2313_p12)
}
  0x3f   :  { %s2317_s0 = scalar_lea.vmem %s51_s12, 128  ;;  %p2322_p0 = scmp.lt.s32.totalorder %s51_s12, %s51_s12 }
  0x40   :  { %p2318_p13 = scmp.ne.s32.totalorder %s51_s12, %s2317_s0  ;;  %p2323_p1 = scmp.lt.s32.totalorder %s2317_s0, %s2317_s0 }
  0x42   :  { %p2324_p2 = por %p2323_p1, %p2322_p0 }
  0x44   :  { %p2325_p3 = pnand %p2324_p2, %p2318_p13 }
  0x46   :  { %2328 = shalt.err (!%p2325_p3)
}
  0x47   :  { %53 = dma.hbm_to_vmem [thread:$0]  %s3182_s2, 128, %s51_s12, [#allocation9]  }
  0x48   :  { %s2329_s28 = scalar_lea.hbm %s3184_s4, 4096 }
  0x49   :  { %p2330_p4 = scmp.ne.s32.totalorder %s3184_s4, %s2329_s28  ;;  %p2333_p5 = scmp.lt.u32.totalorder %s2329_s28, %s3184_s4 }
  0x4b   :  { %p2335_p6 = pnand %p2333_p5, %p2330_p4 }
  0x4d   :  { %2338 = shalt.err (!%p2335_p6)
}
  0x4e   :  { %s2339_s17 = scalar_lea.vmem %s72_s15, 4096  ;;  %p2344_p8 = scmp.lt.s32.totalorder %s72_s15, %s72_s15 }
  0x4f   :  { %p2340_p7 = scmp.ne.s32.totalorder %s72_s15, %s2339_s17  ;;  %p2345_p9 = scmp.lt.s32.totalorder %s2339_s17, %s2339_s17 }
  0x51   :  { %p2346_p10 = por %p2345_p9, %p2344_p8 }
  0x53   :  { %p2347_p11 = pnand %p2346_p10, %p2340_p7 }
  0x55   :  { %2350 = shalt.err (!%p2347_p11)
}
  0x56   :  { %77 = dma.hbm_to_vmem [thread:$0]  %s3184_s4, 4096, %s72_s15, [#allocation12], %s2453_s1, %s2453_s1, %s2454_s14  }
  0x57   :  { %s2460_s18 = smov [#allocation14]   ;;  %s2351_s23 = scalar_lea.hbm %s3186_s6, 1024 }
  0x58   :  { %s85_s19 = sshll.u32 %s2460_s18, 4  ;;  %p2352_p12 = scmp.ne.s32.totalorder %s3186_s6, %s2351_s23  ;;  %s86_s19 = int_to_ptr.vmem [resolvable:$true] %s85_s19 }
  0x59   :  { %p2355_p13 = scmp.lt.u32.totalorder %s2351_s23, %s3186_s6 }
  0x5b   :  { %p2357_p0 = pnand %p2355_p13, %p2352_p12 }
  0x5d   :  { %2360 = shalt.err (!%p2357_p0)
}
  0x5e   :  { %s2361_s26 = scalar_lea.vmem %s86_s19, 1024  ;;  %p2366_p2 = scmp.lt.s32.totalorder %s86_s19, %s86_s19 }
  0x5f   :  { %p2362_p1 = scmp.ne.s32.totalorder %s86_s19, %s2361_s26  ;;  %p2367_p3 = scmp.lt.s32.totalorder %s2361_s26, %s2361_s26 }
  0x61   :  { %p2368_p4 = por %p2367_p3, %p2366_p2 }
  0x63   :  { %p2369_p5 = pnand %p2368_p4, %p2362_p1 }
  0x65   :  { %2372 = shalt.err (!%p2369_p5)
}
  0x66   :  { %91 = dma.hbm_to_vmem [thread:$0]  %s3186_s6, 1024, %s86_s19, [#allocation15], %s2456_s3, %s2456_s3, %s2457_s16  }
  0x67   :  { %2439 = dma.done.wait [#allocation6], 512  }
  0x68   :  { %2440 = vsyncadd [#allocation6], 4294966784 }
  0x69   :  { %2441 = dma.done.wait [#allocation9], 256  }
  0x6a   :  { %2442 = vsyncadd [#allocation9], 4294967040 }
  0x6b   :  { %2443 = dma.done.wait [#allocation12], 8192  }
  0x6c   :  { %2444 = vsyncadd [#allocation12], 4294959104 }
  0x6d   :  { %2445 = dma.done.wait [#allocation15], 1024  }
  0x6e   :  { %2446 = vsyncadd [#allocation15], 4294966272  ;;  %v3191_v0 = vmov 0   ;;  %v1973_v1 = vld [vmem:[#allocation11 + $0x4] ss:$16 sps:$4 sm:$0xff]   ;;  %v2028_v41 = vld [vmem:[#allocation5 + $0x8] sm:$0xff]  }
  0x6f   :  { %399 = vmatprep.mubr.bf16.mxu1 %v3191_v0  ;;  %740 = vmatprep.mubr.bf16.mxu0 %v3191_v0  ;;  %v1975_v2 = vld [vmem:[#allocation11] ss:$16 sps:$4 sm:$0xff]   ;;  %v2615_v3 = vld [vmem:[#allocation13 + $0x4] ss:$16 sps:$4 sm:$0xff]   ;;  %v2024_v33 = vld [vmem:[#allocation11 + $0xc] ss:$16 sps:$4 sm:$0xff]  }
  0x70   :  { %367 = vmatprep.subr.bf16.mxu1 %v1973_v1  ;;  %v2617_v4 = vld [vmem:[#allocation13] ss:$16 sps:$4 sm:$0xff]   ;;  %v1979_v5 = vld [vmem:[#allocation11 + $0x24] ss:$16 sps:$4 sm:$0xff]   ;;  %708 = vmatprep.subr.bf16.mxu0 %v2615_v3  ;;  %v2022_v36 = vld [vmem:[#allocation11 + $0x8] ss:$16 sps:$4 sm:$0xff]  }
  0x71   :  { %368 = vmatpush1.bf16.msra.mxu1 %v1975_v2  ;;  %v1981_v6 = vld [vmem:[#allocation11 + $0x20] ss:$16 sps:$4 sm:$0xff]   ;;  %v2620_v7 = vld [vmem:[#allocation13 + $0x24] ss:$16 sps:$4 sm:$0xff]   ;;  %709 = vmatpush1.bf16.msra.mxu0 %v2617_v4  ;;  %v2027_v38 = vld [vmem:[#allocation11 + $0x2c] ss:$16 sps:$4 sm:$0xff]  }
  0x72   :  { %369 = vmatprep.subr.bf16.mxu1 %v1979_v5  ;;  %v2623_v8 = vld [vmem:[#allocation13 + $0x20] ss:$16 sps:$4 sm:$0xff]   ;;  %710 = vmatprep.subr.bf16.mxu0 %v2620_v7  ;;  %v1985_v9 = vld [vmem:[#allocation11 + $0x44] ss:$16 sps:$4 sm:$0xff]   ;;  %v2025_v39 = vld [vmem:[#allocation11 + $0x28] ss:$16 sps:$4 sm:$0xff]  }
  0x73   :  { %v1987_v10 = vld [vmem:[#allocation11 + $0x40] ss:$16 sps:$4 sm:$0xff]   ;;  %v2626_v11 = vld [vmem:[#allocation13 + $0x44] ss:$16 sps:$4 sm:$0xff]   ;;  %v2031_v40 = vld [vmem:[#allocation11 + $0x4c] ss:$16 sps:$4 sm:$0xff]  }
  0x74   :  { %v1991_v12 = vld [vmem:[#allocation11 + $0x64] ss:$16 sps:$4 sm:$0xff]   ;;  %v2629_v13 = vld [vmem:[#allocation13 + $0x40] ss:$16 sps:$4 sm:$0xff]   ;;  %v2029_v42 = vld [vmem:[#allocation11 + $0x48] ss:$16 sps:$4 sm:$0xff]  }
  0x75   :  { %370 = vmatpush1.bf16.msra.mxu1 %v1981_v6  ;;  %711 = vmatpush1.bf16.msra.mxu0 %v2623_v8  ;;  %v2632_v14 = vld [vmem:[#allocation13 + $0x64] ss:$16 sps:$4 sm:$0xff]   ;;  %v1993_v15 = vld [vmem:[#allocation11 + $0x60] ss:$16 sps:$4 sm:$0xff]   ;;  %v2034_v43 = vld [vmem:[#allocation11 + $0x6c] ss:$16 sps:$4 sm:$0xff]  }
  0x76   :  { %371 = vmatprep.subr.bf16.mxu1 %v1985_v9  ;;  %712 = vmatprep.subr.bf16.mxu0 %v2626_v11  ;;  %v1997_v16 = vld [vmem:[#allocation11 + $0x84] ss:$16 sps:$4 sm:$0xff]   ;;  %v2635_v17 = vld [vmem:[#allocation13 + $0x60] ss:$16 sps:$4 sm:$0xff]   ;;  %v2032_v44 = vld [vmem:[#allocation11 + $0x68] ss:$16 sps:$4 sm:$0xff]  }
  0x77   :  { %v2638_v18 = vld [vmem:[#allocation13 + $0x84] ss:$16 sps:$4 sm:$0xff]   ;;  %v1999_v19 = vld [vmem:[#allocation11 + $0x80] ss:$16 sps:$4 sm:$0xff]   ;;  %v2038_v45 = vld [vmem:[#allocation11 + $0x8c] ss:$16 sps:$4 sm:$0xff]  }
  0x78   :  { %v2003_v20 = vld [vmem:[#allocation11 + $0xa4] ss:$16 sps:$4 sm:$0xff]   ;;  %v2641_v21 = vld [vmem:[#allocation13 + $0x80] ss:$16 sps:$4 sm:$0xff]   ;;  %v2036_v47 = vld [vmem:[#allocation11 + $0x88] ss:$16 sps:$4 sm:$0xff]  }
  0x79   :  { %372 = vmatpush1.bf16.msra.mxu1 %v1987_v10  ;;  %713 = vmatpush1.bf16.msra.mxu0 %v2629_v13  ;;  %v2644_v22 = vld [vmem:[#allocation13 + $0xa4] ss:$16 sps:$4 sm:$0xff]   ;;  %v2005_v23 = vld [vmem:[#allocation11 + $0xa0] ss:$16 sps:$4 sm:$0xff]   ;;  %v2041_v48 = vld [vmem:[#allocation11 + $0xac] ss:$16 sps:$4 sm:$0xff]  }
  0x7a   :  { %373 = vmatprep.subr.bf16.mxu1 %v1991_v12  ;;  %714 = vmatprep.subr.bf16.mxu0 %v2632_v14  ;;  %v2009_v24 = vld [vmem:[#allocation11 + $0xc4] ss:$16 sps:$4 sm:$0xff]   ;;  %v2647_v25 = vld [vmem:[#allocation13 + $0xa0] ss:$16 sps:$4 sm:$0xff]   ;;  %v2039_v49 = vld [vmem:[#allocation11 + $0xa8] ss:$16 sps:$4 sm:$0xff]  }
  0x7b   :  { %v2650_v26 = vld [vmem:[#allocation13 + $0xc4] ss:$16 sps:$4 sm:$0xff]   ;;  %v2011_v27 = vld [vmem:[#allocation11 + $0xc0] ss:$16 sps:$4 sm:$0xff]   ;;  %v2045_v50 = vld [vmem:[#allocation11 + $0xcc] ss:$16 sps:$4 sm:$0xff]  }
  0x7c   :  { %v2015_v28 = vld [vmem:[#allocation11 + $0xe4] ss:$16 sps:$4 sm:$0xff]   ;;  %v2653_v29 = vld [vmem:[#allocation13 + $0xc0] ss:$16 sps:$4 sm:$0xff]   ;;  %v2042_v51 = vld [vmem:[#allocation5 + $0x18] sm:$0xff]  }
  0x7d   :  { %374 = vmatpush1.bf16.msra.mxu1 %v1993_v15  ;;  %715 = vmatpush1.bf16.msra.mxu0 %v2635_v17  ;;  %v2656_v30 = vld [vmem:[#allocation13 + $0xe4] ss:$16 sps:$4 sm:$0xff]   ;;  %v2017_v31 = vld [vmem:[#allocation11 + $0xe0] ss:$16 sps:$4 sm:$0xff]   ;;  %v2043_v52 = vld [vmem:[#allocation11 + $0xc8] ss:$16 sps:$4 sm:$0xff]   ;;  %v163_v15 = vlaneseq }
  0x7e   :  { %375 = vmatprep.subr.bf16.mxu1 %v1997_v16  ;;  %716 = vmatprep.subr.bf16.mxu0 %v2638_v18  ;;  %v2658_v32 = vld [vmem:[#allocation13 + $0xe0] ss:$16 sps:$4 sm:$0xff]   ;;  %v2048_v53 = vld [vmem:[#allocation11 + $0xec] ss:$16 sps:$4 sm:$0xff]   ;;  %v2046_v54 = vld [vmem:[#allocation11 + $0xe8] ss:$16 sps:$4 sm:$0xff]  }
  0x7f   :  { %v117_v34 = vld [vmem:[#allocation8] sm:$0xff]  ;;  %v2035_v46 = vld [vmem:[#allocation5 + $0x10] sm:$0xff]   ;;  %v2687_v55 = vld [vmem:[#allocation13 + $0xc] ss:$16 sps:$4 sm:$0xff]   ;;  %v164_v16 = vshrl.u32 %v163_v15, 7 }
  0x80   :  { %v2662_v35 = vld [vmem:[#allocation5] sm:$0xff]   ;;  %v2664_v37 = vpack.c.bf16 %v117_v34, %v117_v34  ;;  %v2691_v56 = vld [vmem:[#allocation13 + $0x8] ss:$16 sps:$4 sm:$0xff]   ;;  %v2694_v57 = vld [vmem:[#allocation13 + $0x2c] ss:$16 sps:$4 sm:$0xff]  }
  0x81   :  { %376 = vmatpush1.bf16.msra.mxu1 %v1999_v19  ;;  %717 = vmatpush1.bf16.msra.mxu0 %v2641_v21  ;;  %v2700_v58 = vld [vmem:[#allocation13 + $0x28] ss:$16 sps:$4 sm:$0xff]   ;;  %v2704_v59 = vld [vmem:[#allocation13 + $0x4c] ss:$16 sps:$4 sm:$0xff]   ;;  %v165_v19 = vsub.s32 0, %v164_v16 }
  0x82   :  { %377 = vmatprep.subr.bf16.mxu1 %v2003_v20  ;;  %718 = vmatprep.subr.bf16.mxu0 %v2644_v22  ;;  %v2707_v60 = vld [vmem:[#allocation13 + $0x48] ss:$16 sps:$4 sm:$0xff]   ;;  %v2710_v61 = vld [vmem:[#allocation13 + $0x6c] ss:$16 sps:$4 sm:$0xff]   ;;  %v161_v20 = vld [vmem:[%s3185_s5] sm:$0xf] }
  0x83   :  { %v2713_v62 = vld [vmem:[#allocation13 + $0x68] ss:$16 sps:$4 sm:$0xff]   ;;  %v2717_v63 = vld [vmem:[#allocation13 + $0x8c] ss:$16 sps:$4 sm:$0xff]  }
  0x84   :  { %v2720_v1 = vld [vmem:[#allocation13 + $0x88] ss:$16 sps:$4 sm:$0xff]   ;;  %v2723_v2 = vld [vmem:[#allocation13 + $0xac] ss:$16 sps:$4 sm:$0xff]  }
  0x85   :  { %378 = vmatpush1.bf16.msra.mxu1 %v2005_v23  ;;  %719 = vmatpush1.bf16.msra.mxu0 %v2647_v25  ;;  %v2726_v5 = vld [vmem:[#allocation13 + $0xa8] ss:$16 sps:$4 sm:$0xff]   ;;  %v2730_v6 = vld [vmem:[#allocation13 + $0xcc] ss:$16 sps:$4 sm:$0xff]   ;;  %v169_v23 = vsub.s32 1, %v164_v16 }
  0x86   :  { %379 = vmatprep.subr.bf16.mxu1 %v2009_v24  ;;  %720 = vmatprep.subr.bf16.mxu0 %v2650_v26  ;;  %v2733_v9 = vld [vmem:[#allocation13 + $0xc8] ss:$16 sps:$4 sm:$0xff]   ;;  %v2736_v10 = vld [vmem:[#allocation13 + $0xec] ss:$16 sps:$4 sm:$0xff]   ;;  %v166_v24 = vrot.slane %v161_v20, %v165_v19 }
  0x87   :  { %v2739_v12 = vld [vmem:[#allocation13 + $0xe8] ss:$16 sps:$4 sm:$0xff]  }
  0x89   :  { %380 = vmatpush1.bf16.msra.mxu1 %v2011_v27  ;;  %721 = vmatpush1.bf16.msra.mxu0 %v2653_v29  ;;  %v170_v27 = vrot.slane %v161_v20, %v169_v23 }
  0x8a   :  { %381 = vmatprep.subr.bf16.mxu1 %v2015_v28  ;;  %722 = vmatprep.subr.bf16.mxu0 %v2656_v30 }
  0x8d   :  { %382 = vmatpush1.bf16.msra.mxu1 %v2017_v31  ;;  %723 = vmatpush1.bf16.msra.mxu0 %v2658_v32 }
  0x8e   :  { %440 = vmatprep.subr.bf16.mxu1 %v2024_v33  ;;  %820 = vmatprep.subr.bf16.mxu0 %v2615_v3 }
  0x90   :  { %400 = vmatmul.mubr.bf16.vlgmr.msra.gmra.mrb[0].mxu1 %v2662_v35  ;;  %741 = vmatmul.mubr.bf16.vlgmr.msra.gmra.mrb[0].mxu0 %v2664_v37 }
  0x91   :  { %441 = vmatpush1.bf16.msra.mxu1 %v2022_v36  ;;  %409 = vmatprep.mubr.bf16.mxu1 %v3191_v0 }
  0x92   :  { %442 = vmatprep.subr.bf16.mxu1 %v2027_v38  ;;  %821 = vmatpush1.bf16.msra.mxu0 %v2617_v4 }
  0x93   :  { %852 = vmatprep.mubr.bf16.mxu0 %v3191_v0  ;;  %822 = vmatprep.subr.bf16.mxu0 %v2620_v7 }
  0x95   :  { %443 = vmatpush1.bf16.msra.mxu1 %v2025_v39 }
  0x96   :  { %444 = vmatprep.subr.bf16.mxu1 %v2031_v40  ;;  %823 = vmatpush1.bf16.msra.mxu0 %v2623_v8 }
  0x97   :  { %824 = vmatprep.subr.bf16.mxu0 %v2626_v11 }
  0x98   :  { %410 = vmatmul.mubr.bf16.gmra.mrb[4].mxu1 %v2028_v41 }
  0x99   :  { %445 = vmatpush1.bf16.msra.mxu1 %v2029_v42  ;;  %419 = vmatprep.mubr.bf16.mxu1 %v3191_v0 }
  0x9a   :  { %446 = vmatprep.subr.bf16.mxu1 %v2034_v43  ;;  %825 = vmatpush1.bf16.msra.mxu0 %v2629_v13 }
  0x9b   :  { %826 = vmatprep.subr.bf16.mxu0 %v2632_v14 }
  0x9d   :  { %447 = vmatpush1.bf16.msra.mxu1 %v2032_v44 }
  0x9e   :  { %448 = vmatprep.subr.bf16.mxu1 %v2038_v45  ;;  %827 = vmatpush1.bf16.msra.mxu0 %v2635_v17 }
  0x9f   :  { %828 = vmatprep.subr.bf16.mxu0 %v2638_v18 }
  0xa0   :  { %420 = vmatmul.mubr.bf16.gmra.mrb[8].mxu1 %v2035_v46 }
  0xa1   :  { %449 = vmatpush1.bf16.msra.mxu1 %v2036_v47  ;;  %429 = vmatprep.mubr.bf16.mxu1 %v3191_v0 }
  0xa2   :  { %450 = vmatprep.subr.bf16.mxu1 %v2041_v48  ;;  %829 = vmatpush1.bf16.msra.mxu0 %v2641_v21 }
  0xa3   :  { %830 = vmatprep.subr.bf16.mxu0 %v2644_v22 }
  0xa5   :  { %451 = vmatpush1.bf16.msra.mxu1 %v2039_v49 }
  0xa6   :  { %452 = vmatprep.subr.bf16.mxu1 %v2045_v50  ;;  %831 = vmatpush1.bf16.msra.mxu0 %v2647_v25 }
  0xa7   :  { %832 = vmatprep.subr.bf16.mxu0 %v2650_v26 }
  0xa8   :  { %430 = vmatmul.mubr.bf16.gmra.mrb[12].mxu1 %v2042_v51 }
  0xa9   :  { %453 = vmatpush1.bf16.msra.mxu1 %v2043_v52  ;;  %472 = vmatprep.mubr.bf16.mxu1 %v3191_v0 }
  0xaa   :  { %454 = vmatprep.subr.bf16.mxu1 %v2048_v53  ;;  %833 = vmatpush1.bf16.msra.mxu0 %v2653_v29 }
  0xab   :  { %834 = vmatprep.subr.bf16.mxu0 %v2656_v30 }
  0xad   :  { %455 = vmatpush1.bf16.msra.mxu1 %v2046_v54 }
  0xae   :  { %749 = vmatprep.subr.bf16.mxu1 %v2687_v55  ;;  %835 = vmatpush1.bf16.msra.mxu0 %v2658_v32 }
  0xaf   :  { %933 = vmatprep.subr.bf16.mxu0 %v2615_v3 }
  0xb0   :  { %473 = vmatmul.mubr.bf16.vlgmr.msra.gmra.mrb[16].mxu1 %v2662_v35 }
  0xb1   :  { %750 = vmatpush1.bf16.msra.mxu1 %v2691_v56  ;;  %482 = vmatprep.mubr.bf16.mxu1 %v3191_v0 }
  0xb2   :  { %751 = vmatprep.subr.bf16.mxu1 %v2694_v57 }
  0xb5   :  { %752 = vmatpush1.bf16.msra.mxu1 %v2700_v58 }
  0xb6   :  { %753 = vmatprep.subr.bf16.mxu1 %v2704_v59 }
  0xb8   :  { %483 = vmatmul.mubr.bf16.gmra.mrb[20].mxu1 %v2028_v41 }
  0xb9   :  { %754 = vmatpush1.bf16.msra.mxu1 %v2707_v60  ;;  %492 = vmatprep.mubr.bf16.mxu1 %v3191_v0 }
  0xba   :  { %755 = vmatprep.subr.bf16.mxu1 %v2710_v61 }
  0xbd   :  { %756 = vmatpush1.bf16.msra.mxu1 %v2713_v62 }
  0xbe   :  { %757 = vmatprep.subr.bf16.mxu1 %v2717_v63 }
  0xc0   :  { %493 = vmatmul.mubr.bf16.gmra.mrb[24].mxu1 %v2035_v46 }
  0xc1   :  { %758 = vmatpush1.bf16.msra.mxu1 %v2720_v1  ;;  %502 = vmatprep.mubr.bf16.mxu1 %v3191_v0 }
  0xc2   :  { %759 = vmatprep.subr.bf16.mxu1 %v2723_v2 }
  0xc5   :  { %760 = vmatpush1.bf16.msra.mxu1 %v2726_v5 }
  0xc6   :  { %761 = vmatprep.subr.bf16.mxu1 %v2730_v6 }
  0xc8   :  { %503 = vmatmul.mubr.bf16.gmra.mrb[28].mxu1 %v2042_v51 }
  0xc9   :  { %762 = vmatpush1.bf16.msra.mxu1 %v2733_v9  ;;  %781 = vmatprep.mubr.bf16.mxu1 %v3191_v0 }
  0xca   :  { %763 = vmatprep.subr.bf16.mxu1 %v2736_v10 }
  0xcd   :  { %764 = vmatpush1.bf16.msra.mxu1 %v2739_v12 }
  0xce   :  { %861 = vmatprep.subr.bf16.mxu1 %v2687_v55 }
  0xd0   :  { %782 = vmatmul.mubr.bf16.vlgmr.msra.gmra.mrb[32].mxu1 %v2664_v37 }
  0xd1   :  { %862 = vmatpush1.bf16.msra.mxu1 %v2691_v56  ;;  %893 = vmatprep.mubr.bf16.mxu1 %v3191_v0 }
  0xd2   :  { %863 = vmatprep.subr.bf16.mxu1 %v2694_v57 }
  0xd5   :  { %864 = vmatpush1.bf16.msra.mxu1 %v2700_v58 }
  0xd6   :  { %865 = vmatprep.subr.bf16.mxu1 %v2704_v59 }
  0xd9   :  { %866 = vmatpush1.bf16.msra.mxu1 %v2707_v60 }
  0xda   :  { %867 = vmatprep.subr.bf16.mxu1 %v2710_v61 }
  0xdd   :  { %868 = vmatpush1.bf16.msra.mxu1 %v2713_v62 }
  0xde   :  { %869 = vmatprep.subr.bf16.mxu1 %v2717_v63 }
  0xe1   :  { %870 = vmatpush1.bf16.msra.mxu1 %v2720_v1 }
  0xe2   :  { %871 = vmatprep.subr.bf16.mxu1 %v2723_v2 }
  0xe5   :  { %872 = vmatpush1.bf16.msra.mxu1 %v2726_v5 }
  0xe6   :  { %873 = vmatprep.subr.bf16.mxu1 %v2730_v6 }
  0xe9   :  { %874 = vmatpush1.bf16.msra.mxu1 %v2733_v9 }
  0xea   :  { %875 = vmatprep.subr.bf16.mxu1 %v2736_v10 }
  0xed   :  { %876 = vmatpush1.bf16.msra.mxu1 %v2739_v12 }
  0xee   :  { %974 = vmatprep.subr.bf16.mxu1 %v2687_v55 }
 0x163   :  { %v401_v28 = vpop.f32.mrb[0].mxu1  ;;  %v742_v36 = vpop.f32.mrb[0].mxu0 }
 0x164   :  { %v402_v31 = vadd.f32 %v401_v28, %v166_v24  ;;  %v403_v33 = vpop.f32.mrb[1].mxu1  ;;  %v744_v40 = vpop.f32.mrb[1].mxu0 }
 0x165   :  { %v404_v34 = vadd.f32 %v403_v33, %v170_v27  ;;  %v405_v35 = vpop.f32.mrb[2].mxu1  ;;  %v746_v43 = vpop.f32.mrb[2].mxu0 }
 0x166   :  { %v2766_v37 = vadd.f32 %v405_v35, %v166_v24  ;;  %v790_v38 = vadd.f32 %v742_v36, %v402_v31  ;;  %v407_v39 = vpop.f32.mrb[3].mxu1  ;;  %v747_v44 = vpop.f32.mrb[3].mxu0 }
 0x167   :  { %v2768_v41 = vadd.f32 %v407_v39, %v170_v27  ;;  %v791_v42 = vadd.f32 %v744_v40, %v404_v34 }
 0x16b   :  { %v411_v45 = vpop.f32.mrb[4].mxu1 }
 0x16c   :  { %v2770_v46 = vadd.f32 %v411_v45, %v166_v24  ;;  %v413_v47 = vpop.f32.mrb[5].mxu1 }
 0x16d   :  { %v2772_v48 = vadd.f32 %v413_v47, %v170_v27  ;;  %v415_v49 = vpop.f32.mrb[6].mxu1  ;;  %v173_v47 = vsub.s32 2, %v164_v16 }
 0x16e   :  { %v2774_v50 = vadd.f32 %v415_v49, %v166_v24  ;;  %v417_v51 = vpop.f32.mrb[7].mxu1  ;;  %v177_v49 = vsub.s32 3, %v164_v16 }
 0x16f   :  { %v2776_v52 = vadd.f32 %v417_v51, %v170_v27 }
 0x171   :  { %3193 = vst [vmem:[#allocation26_spill] sm:$0xff] %v2776_v52 }
 0x173   :  { %v421_v53 = vpop.f32.mrb[8].mxu1 }
 0x174   :  { %v2778_v54 = vadd.f32 %v421_v53, %v166_v24  ;;  %v423_v15 = vpop.f32.mrb[9].mxu1  ;;  %v174_v53 = vrot.slane %v161_v20, %v173_v47 }
 0x175   :  { %v2780_v19 = vadd.f32 %v423_v15, %v170_v27  ;;  %v425_v23 = vpop.f32.mrb[10].mxu1 }
 0x176   :  { %3194 = vst [vmem:[#allocation27_spill] sm:$0xff] %v2778_v54  ;;  %v2782_v28 = vadd.f32 %v425_v23, %v166_v24  ;;  %v427_v31 = vpop.f32.mrb[11].mxu1  ;;  %v178_v23 = vrot.slane %v161_v20, %v177_v49  ;;  %v1888_v20 = vmul.f32 -1.442695, %v790_v38 }
 0x177   :  { %3195 = vst [vmem:[#allocation28_spill] sm:$0xff] %v2780_v19  ;;  %v2784_v33 = vadd.f32 %v427_v31, %v170_v27 }
 0x178   :  { %3196 = vst [vmem:[#allocation29_spill] sm:$0xff] %v2782_v28 }
 0x179   :  { %3197 = vst [vmem:[#allocation30_spill] sm:$0xff] %v2784_v33 }
 0x17b   :  { %v431_v34 = vpop.f32.mrb[12].mxu1 }
 0x17c   :  { %v2786_v35 = vadd.f32 %v431_v34, %v166_v24  ;;  %v433_v36 = vpop.f32.mrb[13].mxu1 }
 0x17d   :  { %v2788_v39 = vadd.f32 %v433_v36, %v170_v27  ;;  %v435_v40 = vpop.f32.mrb[14].mxu1 }
 0x17e   :  { %3198 = vst [vmem:[#allocation31_spill] sm:$0xff] %v2786_v35  ;;  %v2790_v43 = vadd.f32 %v435_v40, %v166_v24  ;;  %v437_v44 = vpop.f32.mrb[15].mxu1 }
 0x17f   :  { %3199 = vst [vmem:[#allocation32_spill] sm:$0xff] %v2788_v39  ;;  %v2792_v45 = vadd.f32 %v437_v44, %v170_v27 }
 0x180   :  { %3200 = vst [vmem:[#allocation33_spill] sm:$0xff] %v2790_v43 }
 0x181   :  { %3201 = vst [vmem:[#allocation34_spill] sm:$0xff] %v2792_v45  ;;  %v1889_v45 = vmul.f32 -1.442695, %v791_v42 }
 0x183   :  { %v474_v51 = vpop.f32.mrb[16].mxu1  ;;  %2081 = vpow2.f32 %v1889_v45 }
 0x184   :  { %v476_v15 = vpop.f32.mrb[17].mxu1  ;;  %2083 = vpow2.f32 %v1888_v20 }
 0x185   :  { %v478_v31 = vpop.f32.mrb[18].mxu1  ;;  %v477_v54 = vadd.f32 %v476_v15, %v178_v23 }
 0x186   :  { %v2794_v0 = vadd.f32 %v478_v31, %v174_v53  ;;  %v480_v34 = vpop.f32.mrb[19].mxu1 }
 0x187   :  { %v2796_v35 = vadd.f32 %v480_v34, %v178_v23 }
 0x18b   :  { %v484_v36 = vpop.f32.mrb[20].mxu1 }
 0x18c   :  { %v2798_v39 = vadd.f32 %v484_v36, %v174_v53  ;;  %v486_v24 = vpop.f32.mrb[21].mxu1 }
 0x18d   :  { %v2800_v40 = vadd.f32 %v486_v24, %v178_v23  ;;  %v488_v27 = vpop.f32.mrb[22].mxu1 }
 0x18e   :  { %v2802_v44 = vadd.f32 %v488_v27, %v174_v53  ;;  %v490_v16 = vpop.f32.mrb[23].mxu1 }
 0x18f   :  { %v2804_v47 = vadd.f32 %v490_v16, %v178_v23  ;;  %v2082_v16 = vpop.eup %2081 }
 0x190   :  { %v2084_v20 = vpop.eup %2083 }
 0x191   :  { %3202 = vst [vmem:[#allocation35_spill] sm:$0xff] %v2804_v47 }
 0x193   :  { %v494_v49 = vpop.f32.mrb[24].mxu1 }
 0x194   :  { %v2806_v31 = vadd.f32 %v494_v49, %v174_v53  ;;  %v496_v34 = vpop.f32.mrb[25].mxu1 }
 0x195   :  { %v2808_v43 = vadd.f32 %v496_v34, %v178_v23  ;;  %v498_v36 = vpop.f32.mrb[26].mxu1 }
 0x196   :  { %3203 = vst [vmem:[#allocation36_spill] sm:$0xff] %v2806_v31  ;;  %v2810_v33 = vadd.f32 %v498_v36, %v174_v53  ;;  %v500_v24 = vpop.f32.mrb[27].mxu1  ;;  %v797_v36 = vadd.f32 1.0, %v2084_v20 }
 0x197   :  { %3204 = vst [vmem:[#allocation37_spill] sm:$0xff] %v2808_v43  ;;  %v2812_v28 = vadd.f32 %v500_v24, %v178_v23  ;;  %v803_v43 = vadd.f32 1.0, %v2082_v16 }
 0x198   :  { %3205 = vst [vmem:[#allocation38_spill] sm:$0xff] %v2810_v33  ;;  %v475_v33 = vadd.f32 %v474_v51, %v174_v53 }
 0x199   :  { %3206 = vst [vmem:[#allocation39_spill] sm:$0xff] %v2812_v28  ;;  %2085 = vrcp.f32 %v803_v43 }
 0x19a   :  { %2087 = vrcp.f32 %v797_v36 }
 0x19b   :  { %v504_v27 = vpop.f32.mrb[28].mxu1 }
 0x19c   :  { %v2814_v19 = vadd.f32 %v504_v27, %v174_v53  ;;  %v506_v42 = vpop.f32.mrb[29].mxu1 }
 0x19d   :  { %v2816_v38 = vadd.f32 %v506_v42, %v178_v23  ;;  %v508_v45 = vpop.f32.mrb[30].mxu1 }
 0x19e   :  { %3207 = vst [vmem:[#allocation40_spill] sm:$0xff] %v2814_v19  ;;  %v2818_v49 = vadd.f32 %v508_v45, %v174_v53  ;;  %v510_v31 = vpop.f32.mrb[31].mxu1 }
 0x19f   :  { %3208 = vst [vmem:[#allocation41_spill] sm:$0xff] %v2816_v38  ;;  %v2820_v34 = vadd.f32 %v510_v31, %v178_v23 }
 0x1a0   :  { %3209 = vst [vmem:[#allocation42_spill] sm:$0xff] %v2818_v49  ;;  %v119_v49 = vld [vmem:[#allocation10] sm:$0xff] }
 0x1a1   :  { %3210 = vst [vmem:[#allocation43_spill] sm:$0xff] %v2820_v34 }
 0x1a3   :  { %v783_v24 = vpop.f32.mrb[32].mxu1  ;;  %v2086_v45 = vpop.eup %2085 }
 0x1a4   :  { %v792_v28 = vadd.f32 %v783_v24, %v475_v33  ;;  %v785_v27 = vpop.f32.mrb[33].mxu1  ;;  %v2088_v52 = vpop.eup %2087  ;;  %v813_v34 = vmul.f32 %v2086_v45, %v119_v49 }
 0x1a5   :  { %v793_v19 = vadd.f32 %v785_v27, %v477_v54  ;;  %v787_v47 = vpop.f32.mrb[34].mxu1 }
 0x1a6   :  { %2089 = vtanh.f32 %v792_v28  ;;  %v788_v42 = vpop.f32.mrb[35].mxu1 }
 0x1a7   :  { %v1890_v38 = vmul.f32 -1.442695, %v793_v19 }
 0x1a9   :  { %2091 = vpow2.f32 %v1890_v38 }
 0x1b0   :  { %v2090_v31 = vpop.eup %2089 }
 0x1b1   :  { %v814_v16 = vmul.f32 %v2090_v31, %v2088_v52  ;;  %v3211_v52 = vmov 0  }
 0x1b3   :  { %v2092_v20 = vpop.eup %2091  ;;  %v2822_v51 = vadd.f32 %v814_v16, %v813_v34 }
 0x1b4   :  { %v810_v53 = vadd.f32 1.0, %v2092_v20 }
 0x1b5   :  { %2093 = vtanh.f32 %v2822_v51 }
 0x1b6   :  { %2095 = vrcp.f32 %v810_v53 }
 0x1bf   :  { %v2094_v33 = vpop.eup %2093 }
 0x1c0   :  { %v2096_v54 = vpop.eup %2095 }
 0x1c1   :  { %v2825_v43 = vmul.f32 %v2096_v54, %v2094_v33 }
 0x1c3   :  { %v819_v19 = vpack.c.bf16 %v2825_v43, %v2825_v43 }
 0x1c5   :  { %853 = vmatmul.mubr.bf16.vlgmr.msra.gmra.mrb[4].mxu0 %v819_v19  ;;  %894 = vmatmul.mubr.bf16.vlgmr.msra.gmra.mrb[36].mxu1 %v819_v19 }
 0x1c6   :  { %934 = vmatpush1.bf16.msra.mxu0 %v2617_v4  ;;  %975 = vmatpush1.bf16.msra.mxu1 %v2691_v56 }
 0x1c7   :  { %935 = vmatprep.subr.bf16.mxu0 %v2620_v7  ;;  %976 = vmatprep.subr.bf16.mxu1 %v2694_v57 }
 0x1c8   :  { %965 = vmatprep.mubr.bf16.mxu0 %v3211_v52  ;;  %1006 = vmatprep.mubr.bf16.mxu1 %v3211_v52 }
 0x1ca   :  { %936 = vmatpush1.bf16.msra.mxu0 %v2623_v8  ;;  %977 = vmatpush1.bf16.msra.mxu1 %v2700_v58 }
 0x1cb   :  { %937 = vmatprep.subr.bf16.mxu0 %v2626_v11  ;;  %978 = vmatprep.subr.bf16.mxu1 %v2704_v59 }
 0x1ce   :  { %938 = vmatpush1.bf16.msra.mxu0 %v2629_v13  ;;  %979 = vmatpush1.bf16.msra.mxu1 %v2707_v60 }
 0x1cf   :  { %939 = vmatprep.subr.bf16.mxu0 %v2632_v14  ;;  %980 = vmatprep.subr.bf16.mxu1 %v2710_v61 }
 0x1d2   :  { %940 = vmatpush1.bf16.msra.mxu0 %v2635_v17  ;;  %981 = vmatpush1.bf16.msra.mxu1 %v2713_v62 }
 0x1d3   :  { %941 = vmatprep.subr.bf16.mxu0 %v2638_v18  ;;  %982 = vmatprep.subr.bf16.mxu1 %v2717_v63 }
 0x1d6   :  { %942 = vmatpush1.bf16.msra.mxu0 %v2641_v21  ;;  %983 = vmatpush1.bf16.msra.mxu1 %v2720_v1 }
 0x1d7   :  { %943 = vmatprep.subr.bf16.mxu0 %v2644_v22  ;;  %984 = vmatprep.subr.bf16.mxu1 %v2723_v2 }
 0x1da   :  { %944 = vmatpush1.bf16.msra.mxu0 %v2647_v25  ;;  %985 = vmatpush1.bf16.msra.mxu1 %v2726_v5 }
 0x1db   :  { %945 = vmatprep.subr.bf16.mxu0 %v2650_v26  ;;  %986 = vmatprep.subr.bf16.mxu1 %v2730_v6 }
 0x1de   :  { %946 = vmatpush1.bf16.msra.mxu0 %v2653_v29  ;;  %987 = vmatpush1.bf16.msra.mxu1 %v2733_v9 }
 0x1df   :  { %947 = vmatprep.subr.bf16.mxu0 %v2656_v30  ;;  %988 = vmatprep.subr.bf16.mxu1 %v2736_v10 }
 0x1e2   :  { %948 = vmatpush1.bf16.msra.mxu0 %v2658_v32  ;;  %989 = vmatpush1.bf16.msra.mxu1 %v2739_v12 }
 0x1e3   :  { %1046 = vmatprep.subr.bf16.mxu0 %v2615_v3  ;;  %1087 = vmatprep.subr.bf16.mxu1 %v2687_v55 }
 0x298   :  { %v854_v28 = vpop.f32.mrb[4].mxu0  ;;  %v895_v15 = vpop.f32.mrb[36].mxu1 }
 0x299   :  { %v902_v23 = vadd.f32 %v854_v28, %v2766_v37  ;;  %v904_v47 = vadd.f32 %v895_v15, %v2794_v0  ;;  %v856_v38 = vpop.f32.mrb[5].mxu0  ;;  %v897_v49 = vpop.f32.mrb[37].mxu1 }
 0x29a   :  { %v903_v34 = vadd.f32 %v856_v38, %v2768_v41  ;;  %v905_v36 = vadd.f32 %v897_v49, %v2796_v35  ;;  %v858_v24 = vpop.f32.mrb[6].mxu0  ;;  %v899_v27 = vpop.f32.mrb[38].mxu1 }
 0x29b   :  { %v1891_v42 = vmul.f32 -1.442695, %v902_v23  ;;  %v859_v45 = vpop.f32.mrb[7].mxu0  ;;  %v900_v31 = vpop.f32.mrb[39].mxu1 }
 0x29c   :  { %v1892_v16 = vmul.f32 -1.442695, %v903_v34  ;;  %v1893_v20 = vmul.f32 -1.442695, %v905_v36 }
 0x29d   :  { %2097 = vpow2.f32 %v1891_v42 }
 0x29e   :  { %2099 = vpow2.f32 %v1892_v16 }
 0x29f   :  { %2101 = vpow2.f32 %v1893_v20 }
 0x2a0   :  { %2103 = vtanh.f32 %v904_v47 }
 0x2a7   :  { %v2098_v53 = vpop.eup %2097 }
 0x2a8   :  { %v2100_v33 = vpop.eup %2099  ;;  %v909_v37 = vadd.f32 1.0, %v2098_v53 }
 0x2a9   :  { %v915_v0 = vadd.f32 1.0, %v2100_v33  ;;  %v2102_v41 = vpop.eup %2101 }
 0x2aa   :  { %2105 = vrcp.f32 %v909_v37  ;;  %v2104_v54 = vpop.eup %2103  ;;  %v922_v15 = vadd.f32 1.0, %v2102_v41 }
 0x2ab   :  { %2107 = vrcp.f32 %v915_v0 }
 0x2ac   :  { %2109 = vrcp.f32 %v922_v15 }
 0x2b4   :  { %v2106_v35 = vpop.eup %2105 }
 0x2b5   :  { %v2108_v19 = vpop.eup %2107  ;;  %v926_v28 = vmul.f32 %v2106_v35, %v2104_v54 }
 0x2b6   :  { %v925_v23 = vmul.f32 %v2108_v19, %v2822_v51  ;;  %v2110_v49 = vpop.eup %2109 }
 0x2b8   :  { %v2868_v38 = vadd.f32 %v926_v28, %v925_v23 }
 0x2ba   :  { %2111 = vtanh.f32 %v2868_v38 }
 0x2c4   :  { %v2112_v34 = vpop.eup %2111 }
 0x2c5   :  { %v2871_v36 = vmul.f32 %v2112_v34, %v2110_v49  ;;  %v2921_v34 = vld [vmem:[#allocation13] ss:$16 sps:$4 sm:$0xff]  }
 0x2c7   :  { %v932_v47 = vpack.c.bf16 %v2871_v36, %v2871_v36 }
 0x2c9   :  { %966 = vmatmul.mubr.bf16.vlgmr.msra.gmra.mrb[8].mxu0 %v932_v47  ;;  %1007 = vmatmul.mubr.bf16.vlgmr.msra.gmra.mrb[40].mxu1 %v932_v47  ;;  %v2931_v47 = vld [vmem:[#allocation13 + $0x20] ss:$16 sps:$4 sm:$0xff]  }
 0x2ca   :  { %1047 = vmatpush1.bf16.msra.mxu0 %v2617_v4  ;;  %1088 = vmatpush1.bf16.msra.mxu1 %v2691_v56 }
 0x2cb   :  { %1048 = vmatprep.subr.bf16.mxu0 %v2620_v7  ;;  %1089 = vmatprep.subr.bf16.mxu1 %v2694_v57 }
 0x2cc   :  { %1078 = vmatprep.mubr.bf16.mxu0 %v3211_v52  ;;  %1119 = vmatprep.mubr.bf16.mxu1 %v3211_v52 }
 0x2ce   :  { %1049 = vmatpush1.bf16.msra.mxu0 %v2623_v8  ;;  %1090 = vmatpush1.bf16.msra.mxu1 %v2700_v58 }
 0x2cf   :  { %1050 = vmatprep.subr.bf16.mxu0 %v2626_v11  ;;  %1091 = vmatprep.subr.bf16.mxu1 %v2704_v59 }
 0x2d2   :  { %1051 = vmatpush1.bf16.msra.mxu0 %v2629_v13  ;;  %1092 = vmatpush1.bf16.msra.mxu1 %v2707_v60 }
 0x2d3   :  { %1052 = vmatprep.subr.bf16.mxu0 %v2632_v14  ;;  %1093 = vmatprep.subr.bf16.mxu1 %v2710_v61 }
 0x2d6   :  { %1053 = vmatpush1.bf16.msra.mxu0 %v2635_v17  ;;  %1094 = vmatpush1.bf16.msra.mxu1 %v2713_v62 }
 0x2d7   :  { %1054 = vmatprep.subr.bf16.mxu0 %v2638_v18  ;;  %1095 = vmatprep.subr.bf16.mxu1 %v2717_v63 }
 0x2da   :  { %1055 = vmatpush1.bf16.msra.mxu0 %v2641_v21  ;;  %1096 = vmatpush1.bf16.msra.mxu1 %v2720_v1 }
 0x2db   :  { %1056 = vmatprep.subr.bf16.mxu0 %v2644_v22  ;;  %1097 = vmatprep.subr.bf16.mxu1 %v2723_v2 }
 0x2de   :  { %1057 = vmatpush1.bf16.msra.mxu0 %v2647_v25  ;;  %1098 = vmatpush1.bf16.msra.mxu1 %v2726_v5 }
 0x2df   :  { %1058 = vmatprep.subr.bf16.mxu0 %v2650_v26  ;;  %1099 = vmatprep.subr.bf16.mxu1 %v2730_v6 }
 0x2e2   :  { %1059 = vmatpush1.bf16.msra.mxu0 %v2653_v29  ;;  %1100 = vmatpush1.bf16.msra.mxu1 %v2733_v9 }
 0x2e3   :  { %1060 = vmatprep.subr.bf16.mxu0 %v2656_v30  ;;  %1101 = vmatprep.subr.bf16.mxu1 %v2736_v10 }
 0x2e6   :  { %1061 = vmatpush1.bf16.msra.mxu0 %v2658_v32  ;;  %1102 = vmatpush1.bf16.msra.mxu1 %v2739_v12 }
 0x2e7   :  { %1159 = vmatprep.subr.bf16.mxu0 %v2615_v3  ;;  %1200 = vmatprep.subr.bf16.mxu1 %v2687_v55 }
 0x39c   :  { %v967_v4 = vpop.f32.mrb[8].mxu0  ;;  %v1008_v7 = vpop.f32.mrb[40].mxu1 }
 0x39d   :  { %v1015_v8 = vadd.f32 %v967_v4, %v2770_v46  ;;  %v1017_v11 = vadd.f32 %v1008_v7, %v2798_v39  ;;  %v969_v13 = vpop.f32.mrb[9].mxu0  ;;  %v1010_v14 = vpop.f32.mrb[41].mxu1  ;;  %v2935_v4 = vld [vmem:[#allocation13 + $0x44] ss:$16 sps:$4 sm:$0xff]   ;;  %v2939_v7 = vld [vmem:[#allocation13 + $0x40] ss:$16 sps:$4 sm:$0xff]  }
 0x39e   :  { %v1016_v51 = vadd.f32 %v969_v13, %v2772_v48  ;;  %v1018_v24 = vadd.f32 %v1010_v14, %v2800_v40  ;;  %v971_v27 = vpop.f32.mrb[10].mxu0  ;;  %v1012_v42 = vpop.f32.mrb[42].mxu1  ;;  %v3213_v13 = vld [vmem:[#allocation35_spill] sm:$0xff] }
 0x39f   :  { %v1894_v45 = vmul.f32 -1.442695, %v1015_v8  ;;  %v972_v31 = vpop.f32.mrb[11].mxu0  ;;  %v1013_v16 = vpop.f32.mrb[43].mxu1  ;;  %v2943_v8 = vld [vmem:[#allocation13 + $0x64] ss:$16 sps:$4 sm:$0xff]  }
 0x3a0   :  { %v1895_v3 = vmul.f32 -1.442695, %v1016_v51  ;;  %v1896_v20 = vmul.f32 -1.442695, %v1018_v24 }
 0x3a1   :  { %2113 = vpow2.f32 %v1894_v45 }
 0x3a2   :  { %2115 = vpow2.f32 %v1895_v3 }
 0x3a3   :  { %2117 = vpow2.f32 %v1896_v20 }
 0x3a4   :  { %2119 = vtanh.f32 %v1017_v11 }
 0x3ab   :  { %v2114_v53 = vpop.eup %2113 }
 0x3ac   :  { %v2116_v33 = vpop.eup %2115  ;;  %v1022_v46 = vadd.f32 1.0, %v2114_v53 }
 0x3ad   :  { %v1028_v39 = vadd.f32 1.0, %v2116_v33  ;;  %v2118_v48 = vpop.eup %2117 }
 0x3ae   :  { %2121 = vrcp.f32 %v1022_v46  ;;  %v2120_v37 = vpop.eup %2119  ;;  %v1035_v54 = vadd.f32 1.0, %v2118_v48 }
 0x3af   :  { %2123 = vrcp.f32 %v1028_v39 }
 0x3b0   :  { %2125 = vrcp.f32 %v1035_v54 }
 0x3b8   :  { %v2122_v40 = vpop.eup %2121 }
 0x3b9   :  { %v2124_v0 = vpop.eup %2123  ;;  %v1039_v41 = vmul.f32 %v2122_v40, %v2120_v37 }
 0x3ba   :  { %v1038_v35 = vmul.f32 %v2124_v0, %v2868_v38  ;;  %v2126_v28 = vpop.eup %2125  ;;  %v2925_v38 = vld [vmem:[#allocation13 + $0x24] ss:$16 sps:$4 sm:$0xff]  }
 0x3bc   :  { %v2914_v19 = vadd.f32 %v1039_v41, %v1038_v35 }
 0x3be   :  { %2127 = vtanh.f32 %v2914_v19 }
 0x3c8   :  { %v2128_v15 = vpop.eup %2127 }
 0x3c9   :  { %v2917_v23 = vmul.f32 %v2128_v15, %v2126_v28  ;;  %v2999_v28 = vld [vmem:[#allocation13 + $0x84] ss:$16 sps:$4 sm:$0xff]   ;;  %v3003_v15 = vld [vmem:[#allocation13 + $0x80] ss:$16 sps:$4 sm:$0xff]  }
 0x3cb   :  { %v1045_v49 = vpack.c.bf16 %v2917_v23, %v2917_v23 }
 0x3cd   :  { %1079 = vmatmul.mubr.bf16.vlgmr.msra.gmra.mrb[12].mxu0 %v1045_v49  ;;  %1120 = vmatmul.mubr.bf16.vlgmr.msra.gmra.mrb[44].mxu1 %v1045_v49  ;;  %v3007_v49 = vld [vmem:[#allocation13 + $0xa4] ss:$16 sps:$4 sm:$0xff]  }
 0x3ce   :  { %1160 = vmatpush1.bf16.msra.mxu0 %v2921_v34  ;;  %1201 = vmatpush1.bf16.msra.mxu1 %v2691_v56 }
 0x3cf   :  { %1161 = vmatprep.subr.bf16.mxu0 %v2925_v38  ;;  %1202 = vmatprep.subr.bf16.mxu1 %v2694_v57 }
 0x3d0   :  { %1191 = vmatprep.mubr.bf16.mxu0 %v3211_v52  ;;  %1232 = vmatprep.mubr.bf16.mxu1 %v3211_v52 }
 0x3d2   :  { %1162 = vmatpush1.bf16.msra.mxu0 %v2931_v47  ;;  %1203 = vmatpush1.bf16.msra.mxu1 %v2700_v58 }
 0x3d3   :  { %1163 = vmatprep.subr.bf16.mxu0 %v2935_v4  ;;  %1204 = vmatprep.subr.bf16.mxu1 %v2704_v59 }
 0x3d6   :  { %1164 = vmatpush1.bf16.msra.mxu0 %v2939_v7  ;;  %1205 = vmatpush1.bf16.msra.mxu1 %v2707_v60 }
 0x3d7   :  { %1165 = vmatprep.subr.bf16.mxu0 %v2943_v8  ;;  %1206 = vmatprep.subr.bf16.mxu1 %v2710_v61 }
 0x3da   :  { %1166 = vmatpush1.bf16.msra.mxu0 %v2635_v17  ;;  %1207 = vmatpush1.bf16.msra.mxu1 %v2713_v62  ;;  %v2965_v17 = vld [vmem:[#allocation13 + $0x4] ss:$16 sps:$4 sm:$0xff]  }
 0x3db   :  { %1167 = vmatprep.subr.bf16.mxu0 %v2638_v18  ;;  %1208 = vmatprep.subr.bf16.mxu1 %v2717_v63 }
 0x3de   :  { %1168 = vmatpush1.bf16.msra.mxu0 %v2641_v21  ;;  %1209 = vmatpush1.bf16.msra.mxu1 %v2720_v1 }
 0x3df   :  { %1169 = vmatprep.subr.bf16.mxu0 %v2644_v22  ;;  %1210 = vmatprep.subr.bf16.mxu1 %v2723_v2 }
 0x3e2   :  { %1170 = vmatpush1.bf16.msra.mxu0 %v2647_v25  ;;  %1211 = vmatpush1.bf16.msra.mxu1 %v2726_v5 }
 0x3e3   :  { %1171 = vmatprep.subr.bf16.mxu0 %v2650_v26  ;;  %1212 = vmatprep.subr.bf16.mxu1 %v2730_v6 }
 0x3e6   :  { %1172 = vmatpush1.bf16.msra.mxu0 %v2653_v29  ;;  %1213 = vmatpush1.bf16.msra.mxu1 %v2733_v9 }
 0x3e7   :  { %1173 = vmatprep.subr.bf16.mxu0 %v2656_v30  ;;  %1214 = vmatprep.subr.bf16.mxu1 %v2736_v10  ;;  %v3212_v30 = vld [vmem:[#allocation26_spill] sm:$0xff] }
 0x3ea   :  { %1174 = vmatpush1.bf16.msra.mxu0 %v2658_v32  ;;  %1215 = vmatpush1.bf16.msra.mxu1 %v2739_v12 }
 0x3eb   :  { %1272 = vmatprep.subr.bf16.mxu0 %v2965_v17  ;;  %1313 = vmatprep.subr.bf16.mxu1 %v2687_v55 }
 0x4a0   :  { %v1080_v18 = vpop.f32.mrb[12].mxu0  ;;  %v1121_v21 = vpop.f32.mrb[44].mxu1 }
 0x4a1   :  { %v1128_v22 = vadd.f32 %v1080_v18, %v2774_v50  ;;  %v1130_v25 = vadd.f32 %v1121_v21, %v2802_v44  ;;  %v1082_v26 = vpop.f32.mrb[13].mxu0  ;;  %v1123_v29 = vpop.f32.mrb[45].mxu1  ;;  %v3011_v18 = vld [vmem:[#allocation13 + $0xa0] ss:$16 sps:$4 sm:$0xff]   ;;  %v3015_v21 = vld [vmem:[#allocation13 + $0xc4] ss:$16 sps:$4 sm:$0xff]  }
 0x4a2   :  { %v1129_v11 = vadd.f32 %v1082_v26, %v3212_v30  ;;  %v1131_v32 = vadd.f32 %v1123_v29, %v3213_v13  ;;  %v1084_v14 = vpop.f32.mrb[14].mxu0  ;;  %v1125_v51 = vpop.f32.mrb[46].mxu1  ;;  %v3027_v26 = vld [vmem:[#allocation13 + $0xe0] ss:$16 sps:$4 sm:$0xff]  }
 0x4a3   :  { %v1897_v24 = vmul.f32 -1.442695, %v1128_v22  ;;  %v1085_v27 = vpop.f32.mrb[15].mxu0  ;;  %v1126_v42 = vpop.f32.mrb[47].mxu1  ;;  %v3019_v22 = vld [vmem:[#allocation13 + $0xc0] ss:$16 sps:$4 sm:$0xff]  }
 0x4a4   :  { %v1898_v45 = vmul.f32 -1.442695, %v1129_v11  ;;  %v1899_v31 = vmul.f32 -1.442695, %v1131_v32  ;;  %v3214_v11 = vld [vmem:[#allocation27_spill] sm:$0xff]  ;;  %v3215_v32 = vld [vmem:[#allocation36_spill] sm:$0xff] }
 0x4a5   :  { %2129 = vpow2.f32 %v1897_v24  ;;  %v3216_v27 = vld [vmem:[#allocation28_spill] sm:$0xff] }
 0x4a6   :  { %2131 = vpow2.f32 %v1898_v45  ;;  %v3217_v45 = vld [vmem:[#allocation37_spill] sm:$0xff] }
 0x4a7   :  { %2133 = vpow2.f32 %v1899_v31 }
 0x4a8   :  { %2135 = vtanh.f32 %v1130_v25  ;;  %v3023_v25 = vld [vmem:[#allocation13 + $0xe4] ss:$16 sps:$4 sm:$0xff]  }
 0x4af   :  { %v2130_v16 = vpop.eup %2129 }
 0x4b0   :  { %v2132_v3 = vpop.eup %2131  ;;  %v1135_v50 = vadd.f32 1.0, %v2130_v16 }
 0x4b1   :  { %v1141_v44 = vadd.f32 1.0, %v2132_v3  ;;  %v2134_v20 = vpop.eup %2133 }
 0x4b2   :  { %2137 = vrcp.f32 %v1135_v50  ;;  %v2136_v53 = vpop.eup %2135  ;;  %v1148_v48 = vadd.f32 1.0, %v2134_v20 }
 0x4b3   :  { %2139 = vrcp.f32 %v1141_v44 }
 0x4b4   :  { %2141 = vrcp.f32 %v1148_v48 }
 0x4bc   :  { %v2138_v33 = vpop.eup %2137 }
 0x4bd   :  { %v2140_v46 = vpop.eup %2139  ;;  %v1152_v39 = vmul.f32 %v2138_v33, %v2136_v53 }
 0x4be   :  { %v1151_v37 = vmul.f32 %v2140_v46, %v2914_v19  ;;  %v2142_v0 = vpop.eup %2141  ;;  %v2995_v19 = vld [vmem:[#allocation13 + $0x60] ss:$16 sps:$4 sm:$0xff]  }
 0x4c0   :  { %v2974_v40 = vadd.f32 %v1152_v39, %v1151_v37 }
 0x4c2   :  { %2143 = vtanh.f32 %v2974_v40 }
 0x4cc   :  { %v2144_v41 = vpop.eup %2143 }
 0x4cd   :  { %v2977_v54 = vmul.f32 %v2144_v41, %v2142_v0 }
 0x4cf   :  { %v1158_v35 = vpack.c.bf16 %v2977_v54, %v2977_v54 }
 0x4d1   :  { %1192 = vmatmul.mubr.bf16.vlgmr.msra.gmra.mrb[16].mxu0 %v1158_v35  ;;  %1233 = vmatmul.mubr.bf16.vlgmr.msra.gmra.mrb[48].mxu1 %v1158_v35 }
 0x4d2   :  { %1273 = vmatpush1.bf16.msra.mxu0 %v2921_v34  ;;  %1314 = vmatpush1.bf16.msra.mxu1 %v2691_v56 }
 0x4d3   :  { %1274 = vmatprep.subr.bf16.mxu0 %v2925_v38  ;;  %1315 = vmatprep.subr.bf16.mxu1 %v2694_v57 }
 0x4d4   :  { %1304 = vmatprep.mubr.bf16.mxu0 %v3211_v52  ;;  %1345 = vmatprep.mubr.bf16.mxu1 %v3211_v52 }
 0x4d6   :  { %1275 = vmatpush1.bf16.msra.mxu0 %v2931_v47  ;;  %1316 = vmatpush1.bf16.msra.mxu1 %v2700_v58 }
 0x4d7   :  { %1276 = vmatprep.subr.bf16.mxu0 %v2935_v4  ;;  %1317 = vmatprep.subr.bf16.mxu1 %v2704_v59 }
 0x4da   :  { %1277 = vmatpush1.bf16.msra.mxu0 %v2939_v7  ;;  %1318 = vmatpush1.bf16.msra.mxu1 %v2707_v60 }
 0x4db   :  { %1278 = vmatprep.subr.bf16.mxu0 %v2943_v8  ;;  %1319 = vmatprep.subr.bf16.mxu1 %v2710_v61 }
 0x4de   :  { %1279 = vmatpush1.bf16.msra.mxu0 %v2995_v19  ;;  %1320 = vmatpush1.bf16.msra.mxu1 %v2713_v62 }
 0x4df   :  { %1280 = vmatprep.subr.bf16.mxu0 %v2999_v28  ;;  %1321 = vmatprep.subr.bf16.mxu1 %v2717_v63 }
 0x4e2   :  { %1281 = vmatpush1.bf16.msra.mxu0 %v3003_v15  ;;  %1322 = vmatpush1.bf16.msra.mxu1 %v2720_v1 }
 0x4e3   :  { %1282 = vmatprep.subr.bf16.mxu0 %v3007_v49  ;;  %1323 = vmatprep.subr.bf16.mxu1 %v2723_v2 }
 0x4e6   :  { %1283 = vmatpush1.bf16.msra.mxu0 %v3011_v18  ;;  %1324 = vmatpush1.bf16.msra.mxu1 %v2726_v5 }
 0x4e7   :  { %1284 = vmatprep.subr.bf16.mxu0 %v3015_v21  ;;  %1325 = vmatprep.subr.bf16.mxu1 %v2730_v6 }
 0x4ea   :  { %1285 = vmatpush1.bf16.msra.mxu0 %v3019_v22  ;;  %1326 = vmatpush1.bf16.msra.mxu1 %v2733_v9 }
 0x4eb   :  { %1286 = vmatprep.subr.bf16.mxu0 %v3023_v25  ;;  %1327 = vmatprep.subr.bf16.mxu1 %v2736_v10 }
 0x4ee   :  { %1287 = vmatpush1.bf16.msra.mxu0 %v3027_v26  ;;  %1328 = vmatpush1.bf16.msra.mxu1 %v2739_v12 }
 0x4ef   :  { %1385 = vmatprep.subr.bf16.mxu0 %v2965_v17  ;;  %1426 = vmatprep.subr.bf16.mxu1 %v2687_v55 }
 0x5a4   :  { %v1193_v29 = vpop.f32.mrb[16].mxu0  ;;  %v1234_v30 = vpop.f32.mrb[48].mxu1 }
 0x5a5   :  { %v1241_v13 = vadd.f32 %v1193_v29, %v3214_v11  ;;  %v1243_v14 = vadd.f32 %v1234_v30, %v3215_v32  ;;  %v1195_v51 = vpop.f32.mrb[17].mxu0  ;;  %v1236_v24 = vpop.f32.mrb[49].mxu1 }
 0x5a6   :  { %v1242_v42 = vadd.f32 %v1195_v51, %v3216_v27  ;;  %v1244_v31 = vadd.f32 %v1236_v24, %v3217_v45  ;;  %v1197_v16 = vpop.f32.mrb[18].mxu0  ;;  %v1238_v3 = vpop.f32.mrb[50].mxu1 }
 0x5a7   :  { %v1900_v50 = vmul.f32 -1.442695, %v1241_v13  ;;  %v1198_v44 = vpop.f32.mrb[19].mxu0  ;;  %v1239_v20 = vpop.f32.mrb[51].mxu1 }
 0x5a8   :  { %v1901_v53 = vmul.f32 -1.442695, %v1242_v42  ;;  %v1902_v55 = vmul.f32 -1.442695, %v1244_v31 }
 0x5a9   :  { %2145 = vpow2.f32 %v1900_v50 }
 0x5aa   :  { %2147 = vpow2.f32 %v1901_v53 }
 0x5ab   :  { %2149 = vpow2.f32 %v1902_v55 }
 0x5ac   :  { %2151 = vtanh.f32 %v1243_v14 }
 0x5b3   :  { %v2146_v33 = vpop.eup %2145 }
 0x5b4   :  { %v2148_v46 = vpop.eup %2147  ;;  %v1248_v39 = vadd.f32 1.0, %v2146_v33 }
 0x5b5   :  { %v1254_v48 = vadd.f32 1.0, %v2148_v46  ;;  %v2150_v37 = vpop.eup %2149 }
 0x5b6   :  { %2153 = vrcp.f32 %v1248_v39  ;;  %v2152_v0 = vpop.eup %2151  ;;  %v1261_v30 = vadd.f32 1.0, %v2150_v37 }
 0x5b7   :  { %2155 = vrcp.f32 %v1254_v48 }
 0x5b8   :  { %2157 = vrcp.f32 %v1261_v30  ;;  %v2227_v30 = vld [vmem:[#allocation13 + $0x2c] ss:$16 sps:$4 sm:$0xff]  }
 0x5c0   :  { %v2154_v41 = vpop.eup %2153 }
 0x5c1   :  { %v2156_v35 = vpop.eup %2155  ;;  %v1265_v29 = vmul.f32 %v2154_v41, %v2152_v0 }
 0x5c2   :  { %v1264_v11 = vmul.f32 %v2156_v35, %v2974_v40  ;;  %v2158_v32 = vpop.eup %2157 }
 0x5c4   :  { %v3038_v13 = vadd.f32 %v1265_v29, %v1264_v11  ;;  %v2226_v29 = vld [vmem:[#allocation13 + $0x8] ss:$16 sps:$4 sm:$0xff]  }
 0x5c5   :  { %v2228_v11 = vld [vmem:[#allocation13 + $0x28] ss:$16 sps:$4 sm:$0xff]  }
 0x5c6   :  { %2159 = vtanh.f32 %v3038_v13 }
 0x5d0   :  { %v2160_v51 = vpop.eup %2159 }
 0x5d1   :  { %v3041_v24 = vmul.f32 %v2160_v51, %v2158_v32  ;;  %v2232_v32 = vld [vmem:[#allocation13 + $0x68] ss:$16 sps:$4 sm:$0xff]  }
 0x5d3   :  { %v1271_v14 = vpack.c.bf16 %v3041_v24, %v3041_v24 }
 0x5d5   :  { %1305 = vmatmul.mubr.bf16.vlgmr.msra.gmra.mrb[20].mxu0 %v1271_v14  ;;  %1346 = vmatmul.mubr.bf16.vlgmr.msra.gmra.mrb[52].mxu1 %v1271_v14  ;;  %v3222_v14 = vld [vmem:[#allocation31_spill] sm:$0xff] }
 0x5d6   :  { %1386 = vmatpush1.bf16.msra.mxu0 %v2921_v34  ;;  %1427 = vmatpush1.bf16.msra.mxu1 %v2691_v56  ;;  %v2225_v56 = vld [vmem:[#allocation13 + $0xc] ss:$16 sps:$4 sm:$0xff]  }
 0x5d7   :  { %1387 = vmatprep.subr.bf16.mxu0 %v2925_v38  ;;  %1428 = vmatprep.subr.bf16.mxu1 %v2694_v57 }
 0x5d8   :  { %1417 = vmatprep.mubr.bf16.mxu0 %v3211_v52  ;;  %1458 = vmatprep.mubr.bf16.mxu1 %v3211_v52 }
 0x5da   :  { %1388 = vmatpush1.bf16.msra.mxu0 %v2931_v47  ;;  %1429 = vmatpush1.bf16.msra.mxu1 %v2700_v58 }
 0x5db   :  { %1389 = vmatprep.subr.bf16.mxu0 %v2935_v4  ;;  %1430 = vmatprep.subr.bf16.mxu1 %v2704_v59  ;;  %v3218_v59 = vld [vmem:[#allocation29_spill] sm:$0xff] }
 0x5de   :  { %1390 = vmatpush1.bf16.msra.mxu0 %v2939_v7  ;;  %1431 = vmatpush1.bf16.msra.mxu1 %v2707_v60 }
 0x5df   :  { %1391 = vmatprep.subr.bf16.mxu0 %v2943_v8  ;;  %1432 = vmatprep.subr.bf16.mxu1 %v2710_v61  ;;  %v3219_v61 = vld [vmem:[#allocation38_spill] sm:$0xff] }
 0x5e2   :  { %1392 = vmatpush1.bf16.msra.mxu0 %v2995_v19  ;;  %1433 = vmatpush1.bf16.msra.mxu1 %v2713_v62 }
 0x5e3   :  { %1393 = vmatprep.subr.bf16.mxu0 %v2999_v28  ;;  %1434 = vmatprep.subr.bf16.mxu1 %v2717_v63 }
 0x5e6   :  { %1394 = vmatpush1.bf16.msra.mxu0 %v3003_v15  ;;  %1435 = vmatpush1.bf16.msra.mxu1 %v2720_v1 }
 0x5e7   :  { %1395 = vmatprep.subr.bf16.mxu0 %v3007_v49  ;;  %1436 = vmatprep.subr.bf16.mxu1 %v2723_v2  ;;  %v3220_v2 = vld [vmem:[#allocation30_spill] sm:$0xff] }
 0x5ea   :  { %1396 = vmatpush1.bf16.msra.mxu0 %v3011_v18  ;;  %1437 = vmatpush1.bf16.msra.mxu1 %v2726_v5 }
 0x5eb   :  { %1397 = vmatprep.subr.bf16.mxu0 %v3015_v21  ;;  %1438 = vmatprep.subr.bf16.mxu1 %v2730_v6  ;;  %v3221_v6 = vld [vmem:[#allocation39_spill] sm:$0xff] }
 0x5ee   :  { %1398 = vmatpush1.bf16.msra.mxu0 %v3019_v22  ;;  %1439 = vmatpush1.bf16.msra.mxu1 %v2733_v9 }
 0x5ef   :  { %1399 = vmatprep.subr.bf16.mxu0 %v3023_v25  ;;  %1440 = vmatprep.subr.bf16.mxu1 %v2736_v10 }
 0x5f2   :  { %1400 = vmatpush1.bf16.msra.mxu0 %v3027_v26  ;;  %1441 = vmatpush1.bf16.msra.mxu1 %v2739_v12 }
 0x5f3   :  { %1498 = vmatprep.subr.bf16.mxu0 %v2965_v17  ;;  %1539 = vmatprep.subr.bf16.mxu1 %v2225_v56  ;;  %v3223_v56 = vld [vmem:[#allocation40_spill] sm:$0xff] }
 0x6a8   :  { %v1306_v57 = vpop.f32.mrb[20].mxu0  ;;  %v1347_v58 = vpop.f32.mrb[52].mxu1 }
 0x6a9   :  { %v1354_v60 = vadd.f32 %v1306_v57, %v3218_v59  ;;  %v1356_v62 = vadd.f32 %v1347_v58, %v3219_v61  ;;  %v1308_v63 = vpop.f32.mrb[21].mxu0  ;;  %v1349_v1 = vpop.f32.mrb[53].mxu1  ;;  %v3224_v59 = vld [vmem:[#allocation32_spill] sm:$0xff]  ;;  %v3225_v61 = vld [vmem:[#allocation41_spill] sm:$0xff] }
 0x6aa   :  { %v1355_v5 = vadd.f32 %v1308_v63, %v3220_v2  ;;  %v1357_v9 = vadd.f32 %v1349_v1, %v3221_v6  ;;  %v1310_v10 = vpop.f32.mrb[22].mxu0  ;;  %v1351_v40 = vpop.f32.mrb[54].mxu1 }
 0x6ab   :  { %v1903_v27 = vmul.f32 -1.442695, %v1354_v60  ;;  %v1311_v12 = vpop.f32.mrb[23].mxu0  ;;  %v1352_v42 = vpop.f32.mrb[55].mxu1 }
 0x6ac   :  { %v1904_v17 = vmul.f32 -1.442695, %v1355_v5  ;;  %v1905_v45 = vmul.f32 -1.442695, %v1357_v9 }
 0x6ad   :  { %2161 = vpow2.f32 %v1903_v27 }
 0x6ae   :  { %2163 = vpow2.f32 %v1904_v17 }
 0x6af   :  { %2165 = vpow2.f32 %v1905_v45 }
 0x6b0   :  { %2167 = vtanh.f32 %v1356_v62 }
 0x6b7   :  { %v2162_v31 = vpop.eup %2161 }
 0x6b8   :  { %v2164_v16 = vpop.eup %2163  ;;  %v1361_v3 = vadd.f32 1.0, %v2162_v31 }
 0x6b9   :  { %v1367_v50 = vadd.f32 1.0, %v2164_v16  ;;  %v2166_v44 = vpop.eup %2165 }
 0x6ba   :  { %2169 = vrcp.f32 %v1361_v3  ;;  %v2168_v20 = vpop.eup %2167  ;;  %v1374_v46 = vadd.f32 1.0, %v2166_v44 }
 0x6bb   :  { %2171 = vrcp.f32 %v1367_v50 }
 0x6bc   :  { %2173 = vrcp.f32 %v1374_v46  ;;  %v1620_v46 = vpack.c.bf16 %v2871_v36, %v2825_v43  ;;  %v2080_v43 = vld [vmem:[#allocation14 + $0x38] sm:$0xff]   ;;  %v1621_v36 = vpack.c.bf16 %v2977_v54, %v2917_v23 }
 0x6c4   :  { %v2170_v53 = vpop.eup %2169 }
 0x6c5   :  { %v2172_v55 = vpop.eup %2171  ;;  %v1378_v33 = vmul.f32 %v2170_v53, %v2168_v20 }
 0x6c6   :  { %v1377_v39 = vmul.f32 %v2172_v55, %v3038_v13  ;;  %v2174_v37 = vpop.eup %2173  ;;  %v2229_v13 = vld [vmem:[#allocation13 + $0x4c] ss:$16 sps:$4 sm:$0xff]  }
 0x6c8   :  { %v3083_v48 = vadd.f32 %v1378_v33, %v1377_v39  ;;  %v2074_v33 = vld [vmem:[#allocation14 + $0x8] sm:$0xff]   ;;  %v2075_v39 = vld [vmem:[#allocation14 + $0x10] sm:$0xff]  }
 0x6ca   :  { %2175 = vtanh.f32 %v3083_v48 }
 0x6d4   :  { %v2176_v0 = vpop.eup %2175 }
 0x6d5   :  { %v3086_v41 = vmul.f32 %v2176_v0, %v2174_v37  ;;  %v2077_v37 = vld [vmem:[#allocation14 + $0x20] sm:$0xff]   ;;  %v2078_v0 = vld [vmem:[#allocation14 + $0x28] sm:$0xff]  }
 0x6d7   :  { %v1384_v35 = vpack.c.bf16 %v3086_v41, %v3086_v41 }
 0x6d9   :  { %1418 = vmatmul.mubr.bf16.vlgmr.msra.gmra.mrb[24].mxu0 %v1384_v35  ;;  %1459 = vmatmul.mubr.bf16.vlgmr.msra.gmra.mrb[56].mxu1 %v1384_v35  ;;  %v2079_v35 = vld [vmem:[#allocation14 + $0x30] sm:$0xff]  }
 0x6da   :  { %1499 = vmatpush1.bf16.msra.mxu0 %v2921_v34  ;;  %1540 = vmatpush1.bf16.msra.mxu1 %v2226_v29  ;;  %v2230_v34 = vld [vmem:[#allocation13 + $0x48] ss:$16 sps:$4 sm:$0xff]   ;;  %v1622_v29 = vpack.c.bf16 %v3086_v41, %v3041_v24 }
 0x6db   :  { %1500 = vmatprep.subr.bf16.mxu0 %v2925_v38  ;;  %1541 = vmatprep.subr.bf16.mxu1 %v2227_v30  ;;  %v2231_v38 = vld [vmem:[#allocation13 + $0x6c] ss:$16 sps:$4 sm:$0xff]  }
 0x6dc   :  { %1530 = vmatprep.mubr.bf16.mxu0 %v3211_v52  ;;  %1571 = vmatprep.mubr.bf16.mxu1 %v3211_v52  ;;  %v2233_v52 = vld [vmem:[#allocation13 + $0x8c] ss:$16 sps:$4 sm:$0xff]  }
 0x6de   :  { %1501 = vmatpush1.bf16.msra.mxu0 %v2931_v47  ;;  %1542 = vmatpush1.bf16.msra.mxu1 %v2228_v11  ;;  %v2234_v47 = vld [vmem:[#allocation13 + $0x88] ss:$16 sps:$4 sm:$0xff]  }
 0x6df   :  { %1502 = vmatprep.subr.bf16.mxu0 %v2935_v4  ;;  %1543 = vmatprep.subr.bf16.mxu1 %v2229_v13  ;;  %v2235_v4 = vld [vmem:[#allocation13 + $0xac] ss:$16 sps:$4 sm:$0xff]  }
 0x6e0   :  { %v3226_v13 = vld [vmem:[#allocation33_spill] sm:$0xff] }
 0x6e2   :  { %1503 = vmatpush1.bf16.msra.mxu0 %v2939_v7  ;;  %1544 = vmatpush1.bf16.msra.mxu1 %v2230_v34  ;;  %v2236_v7 = vld [vmem:[#allocation13 + $0xa8] ss:$16 sps:$4 sm:$0xff]  }
 0x6e3   :  { %1504 = vmatprep.subr.bf16.mxu0 %v2943_v8  ;;  %1545 = vmatprep.subr.bf16.mxu1 %v2231_v38  ;;  %v2237_v8 = vld [vmem:[#allocation13 + $0xcc] ss:$16 sps:$4 sm:$0xff]   ;;  %v3227_v38 = vld [vmem:[#allocation42_spill] sm:$0xff] }
 0x6e6   :  { %1505 = vmatpush1.bf16.msra.mxu0 %v2995_v19  ;;  %1546 = vmatpush1.bf16.msra.mxu1 %v2232_v32  ;;  %v2238_v19 = vld [vmem:[#allocation13 + $0xc8] ss:$16 sps:$4 sm:$0xff]  }
 0x6e7   :  { %1506 = vmatprep.subr.bf16.mxu0 %v2999_v28  ;;  %1547 = vmatprep.subr.bf16.mxu1 %v2233_v52  ;;  %v2239_v28 = vld [vmem:[#allocation13 + $0xec] ss:$16 sps:$4 sm:$0xff]  }
 0x6ea   :  { %1507 = vmatpush1.bf16.msra.mxu0 %v3003_v15  ;;  %1548 = vmatpush1.bf16.msra.mxu1 %v2234_v47  ;;  %v2240_v15 = vld [vmem:[#allocation13 + $0xe8] ss:$16 sps:$4 sm:$0xff]  }
 0x6eb   :  { %1508 = vmatprep.subr.bf16.mxu0 %v3007_v49  ;;  %1549 = vmatprep.subr.bf16.mxu1 %v2235_v4  ;;  %v2073_v49 = vld [vmem:[#allocation14] sm:$0xff]   ;;  %v3228_v4 = vld [vmem:[#allocation34_spill] sm:$0xff] }
 0x6ee   :  { %1509 = vmatpush1.bf16.msra.mxu0 %v3011_v18  ;;  %1550 = vmatpush1.bf16.msra.mxu1 %v2236_v7 }
 0x6ef   :  { %1510 = vmatprep.subr.bf16.mxu0 %v3015_v21  ;;  %1551 = vmatprep.subr.bf16.mxu1 %v2237_v8  ;;  %v3229_v8 = vld [vmem:[#allocation43_spill] sm:$0xff] }
 0x6f2   :  { %1511 = vmatpush1.bf16.msra.mxu0 %v3019_v22  ;;  %1552 = vmatpush1.bf16.msra.mxu1 %v2238_v19 }
 0x6f3   :  { %1512 = vmatprep.subr.bf16.mxu0 %v3023_v25  ;;  %1553 = vmatprep.subr.bf16.mxu1 %v2239_v28 }
 0x6f6   :  { %1513 = vmatpush1.bf16.msra.mxu0 %v3027_v26  ;;  %1554 = vmatpush1.bf16.msra.mxu1 %v2240_v15 }
 0x6f7   :  { %1933 = vmatprep.subr.bf16.mxu0 %v2073_v49 }
 0x7ac   :  { %v1419_v18 = vpop.f32.mrb[24].mxu0  ;;  %v1460_v51 = vpop.f32.mrb[56].mxu1 }
 0x7ad   :  { %v1467_v21 = vadd.f32 %v1419_v18, %v3222_v14  ;;  %v1469_v57 = vadd.f32 %v1460_v51, %v3223_v56  ;;  %v1421_v58 = vpop.f32.mrb[25].mxu0  ;;  %v1462_v22 = vpop.f32.mrb[57].mxu1 }
 0x7ae   :  { %v1468_v60 = vadd.f32 %v1421_v58, %v3224_v59  ;;  %v1470_v25 = vadd.f32 %v1462_v22, %v3225_v61  ;;  %v1423_v62 = vpop.f32.mrb[26].mxu0  ;;  %v1464_v63 = vpop.f32.mrb[58].mxu1 }
 0x7af   :  { %v1906_v1 = vmul.f32 -1.442695, %v1467_v21  ;;  %v1424_v26 = vpop.f32.mrb[27].mxu0  ;;  %v1465_v2 = vpop.f32.mrb[59].mxu1 }
 0x7b0   :  { %v1907_v5 = vmul.f32 -1.442695, %v1468_v60  ;;  %v1908_v6 = vmul.f32 -1.442695, %v1470_v25  ;;  %v3133_v25 = vld [vmem:[%s3187_s7] ss:$0 sm:$0xff] }
 0x7b1   :  { %2177 = vpow2.f32 %v1906_v1  ;;  %s2462_s7 = smov [#allocation17]  }
 0x7b2   :  { %2179 = vpow2.f32 %v1907_v5  ;;  %s1791_s16 = sshll.u32 %s2462_s7, 4  ;;  %s1792_s16 = int_to_ptr.vmem [resolvable:$true] %s1791_s16 }
 0x7b3   :  { %2181 = vpow2.f32 %v1908_v6  ;;  %s2373_s15 = scalar_lea.vmem %s1792_s16, 128  ;;  %p2378_p7 = scmp.lt.s32.totalorder %s1792_s16, %s1792_s16 }
 0x7b4   :  { %2183 = vtanh.f32 %v1469_v57  ;;  %p2374_p6 = scmp.ne.s32.totalorder %s1792_s16, %s2373_s15  ;;  %p2379_p8 = scmp.lt.s32.totalorder %s2373_s15, %s2373_s15 }
 0x7b6   :  { %p2380_p9 = por %p2379_p8, %p2378_p7 }
 0x7b8   :  { %p2381_p10 = pnand %p2380_p9, %p2374_p6 }
 0x7bb   :  { %v2178_v9 = vpop.eup %2177 }
 0x7bc   :  { %v2180_v10 = vpop.eup %2179  ;;  %v1474_v40 = vadd.f32 1.0, %v2178_v9 }
 0x7bd   :  { %v1480_v27 = vadd.f32 1.0, %v2180_v10  ;;  %v2182_v12 = vpop.eup %2181 }
 0x7be   :  { %2185 = vrcp.f32 %v1474_v40  ;;  %v2184_v42 = vpop.eup %2183  ;;  %v1487_v16 = vadd.f32 1.0, %v2182_v12 }
 0x7bf   :  { %2187 = vrcp.f32 %v1480_v27 }
 0x7c0   :  { %2189 = vrcp.f32 %v1487_v16 }
 0x7c8   :  { %v2186_v17 = vpop.eup %2185 }
 0x7c9   :  { %v2188_v45 = vpop.eup %2187  ;;  %v1491_v31 = vmul.f32 %v2186_v17, %v2184_v42 }
 0x7ca   :  { %v1490_v3 = vmul.f32 %v2188_v45, %v3083_v48  ;;  %v2190_v44 = vpop.eup %2189  ;;  %v2076_v48 = vld [vmem:[#allocation14 + $0x18] sm:$0xff]  }
 0x7cc   :  { %v3112_v50 = vadd.f32 %v1491_v31, %v1490_v3 }
 0x7ce   :  { %2191 = vtanh.f32 %v3112_v50 }
 0x7d8   :  { %v2192_v20 = vpop.eup %2191 }
 0x7d9   :  { %v3115_v53 = vmul.f32 %v2192_v20, %v2190_v44 }
 0x7db   :  { %v1497_v55 = vpack.c.bf16 %v3115_v53, %v3115_v53 }
 0x7dd   :  { %1531 = vmatmul.mubr.bf16.vlgmr.msra.gmra.mrb[28].mxu0 %v1497_v55  ;;  %1572 = vmatmul.mubr.bf16.vlgmr.msra.gmra.mrb[60].mxu1 %v1497_v55 }
 0x7de   :  { %1934 = vmatpush3.bf16.msra.mxu0 %v2073_v49  ;;  %1949 = vmatprep.mubr.bf16.mxu0 %v1620_v46 }
 0x7df   :  { %1935 = vmatprep.subr.bf16.mxu0 %v2074_v33 }
 0x7e2   :  { %1936 = vmatpush3.bf16.msra.mxu0 %v2074_v33 }
 0x7e3   :  { %1937 = vmatprep.subr.bf16.mxu0 %v2075_v39 }
 0x7e6   :  { %1938 = vmatpush3.bf16.msra.mxu0 %v2075_v39 }
 0x7e7   :  { %1939 = vmatprep.subr.bf16.mxu0 %v2076_v48 }
 0x7ea   :  { %1940 = vmatpush3.bf16.msra.mxu0 %v2076_v48 }
 0x7eb   :  { %1941 = vmatprep.subr.bf16.mxu0 %v2077_v37 }
 0x7ee   :  { %1942 = vmatpush3.bf16.msra.mxu0 %v2077_v37 }
 0x7ef   :  { %1943 = vmatprep.subr.bf16.mxu0 %v2078_v0 }
 0x7f2   :  { %1944 = vmatpush3.bf16.msra.mxu0 %v2078_v0 }
 0x7f3   :  { %1945 = vmatprep.subr.bf16.mxu0 %v2079_v35 }
 0x7f6   :  { %1946 = vmatpush3.bf16.msra.mxu0 %v2079_v35 }
 0x7f7   :  { %1947 = vmatprep.subr.bf16.mxu0 %v2080_v43 }
 0x7fa   :  { %1948 = vmatpush3.bf16.msra.mxu0 %v2080_v43 }
 0x7fd   :  { %1950 = vmatmul.mubr.bf16.vlgmr.msra.gmra.mrb[32].mxu0 %v1621_v36 }
 0x7fe   :  { %1953 = vmatprep.mubr.bf16.mxu0 %v1622_v29 }
 0x8b0   :  { %v1532_v30 = vpop.f32.mrb[28].mxu0  ;;  %v1573_v11 = vpop.f32.mrb[60].mxu1 }
 0x8b1   :  { %v1580_v34 = vadd.f32 %v1532_v30, %v3226_v13  ;;  %v1582_v32 = vadd.f32 %v1573_v11, %v3227_v38  ;;  %v1534_v52 = vpop.f32.mrb[29].mxu0  ;;  %v1575_v47 = vpop.f32.mrb[61].mxu1 }
 0x8b2   :  { %v1581_v7 = vadd.f32 %v1534_v52, %v3228_v4  ;;  %v1583_v19 = vadd.f32 %v1575_v47, %v3229_v8  ;;  %v1536_v28 = vpop.f32.mrb[30].mxu0  ;;  %v1577_v15 = vpop.f32.mrb[62].mxu1 }
 0x8b3   :  { %v1909_v23 = vmul.f32 -1.442695, %v1580_v34  ;;  %v1537_v54 = vpop.f32.mrb[31].mxu0  ;;  %v1578_v49 = vpop.f32.mrb[63].mxu1 }
 0x8b4   :  { %v1910_v24 = vmul.f32 -1.442695, %v1581_v7  ;;  %v1911_v41 = vmul.f32 -1.442695, %v1583_v19 }
 0x8b5   :  { %2193 = vpow2.f32 %v1909_v23 }
 0x8b6   :  { %2195 = vpow2.f32 %v1910_v24 }
 0x8b7   :  { %2197 = vpow2.f32 %v1911_v41 }
 0x8b8   :  { %2199 = vtanh.f32 %v1582_v32 }
 0x8bf   :  { %v2194_v18 = vpop.eup %2193 }
 0x8c0   :  { %v2196_v51 = vpop.eup %2195  ;;  %v1587_v14 = vadd.f32 1.0, %v2194_v18 }
 0x8c1   :  { %v1593_v21 = vadd.f32 1.0, %v2196_v51  ;;  %v2198_v56 = vpop.eup %2197 }
 0x8c2   :  { %2201 = vrcp.f32 %v1587_v14  ;;  %v2200_v57 = vpop.eup %2199  ;;  %v1600_v60 = vadd.f32 1.0, %v2198_v56 }
 0x8c3   :  { %2203 = vrcp.f32 %v1593_v21 }
 0x8c4   :  { %2205 = vrcp.f32 %v1600_v60 }
 0x8cc   :  { %v2202_v58 = vpop.eup %2201 }
 0x8cd   :  { %v2204_v22 = vpop.eup %2203  ;;  %v1604_v59 = vmul.f32 %v2202_v58, %v2200_v57 }
 0x8ce   :  { %v1603_v61 = vmul.f32 %v2204_v22, %v3112_v50  ;;  %v2206_v40 = vpop.eup %2205 }
 0x8d0   :  { %v1605_v62 = vadd.f32 %v1604_v59, %v1603_v61  ;;  %v1951_v63 = vpop.f32.mrb[32].mxu0 }
 0x8d1   :  { %v1738_v1 = vadd.f32 %v1951_v63, %v3133_v25  ;;  %v1729_v26 = vpop.f32.mrb[33].mxu0 }
 0x8d2   :  { %1772 = vst [vmem:[#allocation19] sm:$0xff] %v1605_v62  ;;  %v1730_v2 = vadd.f32 %v3133_v25, %v1729_v26  ;;  %v1952_v5 = vpop.f32.mrb[34].mxu0  ;;  %2207 = vtanh.f32 %v1605_v62 }
 0x8d3   :  { %1762 = vst [vmem:[#allocation16 + $0x10] sm:$0xff] %v1738_v1  ;;  %v1741_v6 = vadd.f32 %v1952_v5, %v3133_v25  ;;  %v1732_v9 = vpop.f32.mrb[35].mxu0 }
 0x8d4   :  { %1760 = vst [vmem:[#allocation16] sm:$0xff] %v1730_v2  ;;  %v1733_v10 = vadd.f32 %v3133_v25, %v1732_v9 }
 0x8d5   :  { %1763 = vst [vmem:[#allocation16 + $0x18] sm:$0xff] %v1741_v6 }
 0x8d6   :  { %1761 = vst [vmem:[#allocation16 + $0x8] sm:$0xff] %v1733_v10 }
 0x8dc   :  { %v2208_v27 = vpop.eup %2207 }
 0x8dd   :  { %v1607_v12 = vmul.f32 %v2208_v27, %v2206_v40 }
 0x8df   :  { %v1623_v42 = vpack.c.bf16 %v1607_v12, %v3115_v53  ;;  %1771 = vst [vmem:[#allocation17] sm:$0xff] %v1607_v12 }
 0x8e1   :  { %1954 = vmatmul.mubr.bf16.gmra.mrb[36].mxu0 %v1623_v42 }
 0x8e2   :  { %2384 = shalt.err (!%p2381_p10)
}
 0x8e3   :  { %s2385_s29 = scalar_lea.hbm %s3189_s9, 128 }
 0x8e4   :  { %p2386_p11 = scmp.ne.s32.totalorder %s3189_s9, %s2385_s29  ;;  %p2389_p12 = scmp.lt.u32.totalorder %s2385_s29, %s3189_s9 }
 0x8e6   :  { %p2391_p13 = pnand %p2389_p12, %p2386_p11 }
 0x8e8   :  { %2394 = shalt.err (!%p2391_p13)
}
 0x8e9   :  { %1794 = dma.vmem_to_hbm [thread:$0]  %s1792_s16, 128, %s3189_s9, [#allocation18]  }
 0x8ea   :  { %s2463_s18 = smov [#allocation19]  }
 0x8eb   :  { %s1801_s19 = sshll.u32 %s2463_s18, 4  ;;  %s1802_s19 = int_to_ptr.vmem [resolvable:$true] %s1801_s19 }
 0x8ec   :  { %s2395_s21 = scalar_lea.vmem %s1802_s19, 128  ;;  %p2400_p1 = scmp.lt.s32.totalorder %s1802_s19, %s1802_s19 }
 0x8ed   :  { %p2396_p0 = scmp.ne.s32.totalorder %s1802_s19, %s2395_s21  ;;  %p2401_p2 = scmp.lt.s32.totalorder %s2395_s21, %s2395_s21 }
 0x8ef   :  { %p2402_p3 = por %p2401_p2, %p2400_p1 }
 0x8f1   :  { %p2403_p4 = pnand %p2402_p3, %p2396_p0 }
 0x8f3   :  { %2406 = shalt.err (!%p2403_p4)
}
 0x8f4   :  { %s2407_s24 = scalar_lea.hbm %s3190_s10, 128 }
 0x8f5   :  { %p2408_p5 = scmp.ne.s32.totalorder %s3190_s10, %s2407_s24  ;;  %p2411_p6 = scmp.lt.u32.totalorder %s2407_s24, %s3190_s10 }
 0x8f7   :  { %p2413_p7 = pnand %p2411_p6, %p2408_p5 }
 0x8f9   :  { %2416 = shalt.err (!%p2413_p7)
}
 0x8fa   :  { %1804 = dma.vmem_to_hbm [thread:$0]  %s1802_s19, 128, %s3190_s10, [#allocation18]  }
 0x8fb   :  { %s2464_s1 = smov [#allocation16]  }
 0x8fc   :  { %s1778_s6 = sshll.u32 %s2464_s1, 4  ;;  %s1779_s6 = int_to_ptr.vmem [resolvable:$true] %s1778_s6 }
 0x8fd   :  { %s2417_s10 = scalar_lea.vmem %s1779_s6, 1024  ;;  %p2422_p9 = scmp.lt.s32.totalorder %s1779_s6, %s1779_s6 }
 0x8fe   :  { %p2418_p8 = scmp.ne.s32.totalorder %s1779_s6, %s2417_s10  ;;  %p2423_p10 = scmp.lt.s32.totalorder %s2417_s10, %s2417_s10 }
 0x900   :  { %p2424_p11 = por %p2423_p10, %p2422_p9 }
 0x902   :  { %p2425_p12 = pnand %p2424_p11, %p2418_p8 }
 0x9b4   :  { %v1955_v17 = vpop.f32.mrb[36].mxu0 }
 0x9b5   :  { %v1754_v45 = vadd.f32 %v1955_v17, %v3133_v25  ;;  %v1745_v31 = vpop.f32.mrb[37].mxu0 }
 0x9b6   :  { %v1746_v16 = vadd.f32 %v3133_v25, %v1745_v31  ;;  %v1956_v3 = vpop.f32.mrb[38].mxu0 }
 0x9b7   :  { %1766 = vst [vmem:[#allocation16 + $0x30] sm:$0xff] %v1754_v45  ;;  %v1757_v50 = vadd.f32 %v1956_v3, %v3133_v25  ;;  %v1748_v44 = vpop.f32.mrb[39].mxu0 }
 0x9b8   :  { %1764 = vst [vmem:[#allocation16 + $0x20] sm:$0xff] %v1746_v16  ;;  %v1749_v20 = vadd.f32 %v3133_v25, %v1748_v44 }
 0x9b9   :  { %1767 = vst [vmem:[#allocation16 + $0x38] sm:$0xff] %v1757_v50 }
 0x9ba   :  { %1765 = vst [vmem:[#allocation16 + $0x28] sm:$0xff] %v1749_v20 }
 0x9bb   :  { %2428 = shalt.err (!%p2425_p12)
}
 0x9bc   :  { %s2429_s3 = scalar_lea.hbm %s3188_s8, 1024 }
 0x9bd   :  { %p2430_p13 = scmp.ne.s32.totalorder %s3188_s8, %s2429_s3  ;;  %p2433_p0 = scmp.lt.u32.totalorder %s2429_s3, %s3188_s8 }
 0x9bf   :  { %p2435_p1 = pnand %p2433_p0, %p2430_p13 }
 0x9c1   :  { %2438 = shalt.err (!%p2435_p1)
}
 0x9c2   :  { %s2465_s28 = smov 128   ;;  %s2466_s29 = smov 8  }
 0x9c3   :  { %1784 = dma.vmem_to_hbm [thread:$0]  %s1779_s6, 1024, %s3188_s8, [#allocation7], %s2465_s28, %s2465_s28, %s2466_s29  }
 0x9c4   :  { %2447 = dma.done.wait [#allocation7], 1024  }
 0x9c5   :  { %2448 = vsyncadd [#allocation7], 4294966272 }
 0x9c6   :  { %2449 = dma.done.wait [#allocation18], 256  }
 0x9c7   :  { %2450 = vsyncadd [#allocation18], 4294967040 }
 0x9c8   :  { %1814 = vsyncpa [#allocation6], 1 }
 0x9c9   :  { %1815 = vsyncpa [#allocation9], 1 }
 0x9ca   :  { %1816 = vsyncpa [#allocation12], 1 }
 0x9cb   :  { %1817 = vsyncpa [#allocation15], 1 }
 0x9cc   :  { %1818 = vsyncpa [#allocation7], 1 }
 0x9cd   :  { %1819 = vsyncpa [#allocation18], 1 }

</bundles_post_ra>
